<compile_context>
chip_gen: v5e
topology: v5e:2x2
jax: 0.10.0
libtpu: 0.0.40
codegen_flags: <defaults>
</compile_context>

<pallas_src>
import jax
import jax.numpy as jnp
from jax.experimental import pallas as pl
from jax.experimental.pallas import tpu as pltpu

IN_FEATURES = 512
HIDDEN = 1024
HEAD_N = 128          # w2 (1024, 1) zero-padded to 128 lanes for the MXU head
EPS = 1e-5
NEG_SLOPE = 0.01
MAX_TB = 512          # max batch rows per grid step


def _round_up(x, m):
    return ((x + m - 1) // m) * m


def _discriminator_kernel(x_ref, w1_ref, b1_ref, w2_ref, b2_ref, out_ref):
    # dense1 on the MXU: in-kernel bf16 cast of the f32 activation tile,
    # f32 accumulation. W1 is already bf16 and VMEM-resident.
    x_bf = x_ref[...].astype(jnp.bfloat16)
    h = jnp.dot(x_bf, w1_ref[...], preferred_element_type=jnp.float32)
    h = h + b1_ref[...]                                      # (TB, 1024) f32

    # InstanceNorm1d over the feature axis (per row), fused single-traversal
    # stats: var = E[h^2] - mean^2 (f32, clamped at 0), eps=1e-5, no affine.
    inv_n = 1.0 / HIDDEN
    mean = jnp.sum(h, axis=-1, keepdims=True) * inv_n
    ex2 = jnp.sum(h * h, axis=-1, keepdims=True) * inv_n
    var = jnp.maximum(ex2 - mean * mean, 0.0)
    h_norm = (h - mean) * jax.lax.rsqrt(var + EPS)

    # leaky_relu (negative_slope = 0.01): mul + max instead of cmp+select.
    h_act = jnp.maximum(h_norm, NEG_SLOPE * h_norm)

    # discriminator head on the MXU: w2 zero-padded to 128 lanes; column 0 is
    # the real logit. Replaces the previous VPU mul + XLU lane-reduction and
    # gives a lane-dense (TB, 128) store.
    logits = jnp.dot(h_act.astype(jnp.bfloat16), w2_ref[...],
                     preferred_element_type=jnp.float32)     # (TB, 128) f32
    out_ref[...] = jax.nn.sigmoid(logits + b2_ref[0])


def prepare_params(w1, b1, w2, b2):
    """One-time weight preparation (out of the per-call path):
    bf16 MXU operands and the 1 -> 128 lane zero-padding of w2."""
    w1_bf = w1.astype(jnp.bfloat16)                                   # (512, 1024)
    b1_2d = b1.reshape(1, HIDDEN).astype(jnp.float32)                 # (1, 1024)
    w2_pad = jnp.pad(w2.reshape(HIDDEN, 1).astype(jnp.float32),
                     ((0, 0), (0, HEAD_N - 1))).astype(jnp.bfloat16)  # (1024, 128)
    b2_1d = b2.reshape(1).astype(jnp.float32)                         # (1,)
    return w1_bf, b1_2d, w2_pad, b2_1d


def discriminator_forward(x, params):
    """x: (B, 512, 1, 1) float32 features from base_model; params from prepare_params()."""
    w1_bf, b1_2d, w2_pad, b2_1d = params
    B = x.shape[0]
    x2d = x.reshape(B, -1)                 # flatten(start_dim=1); free reshape, no cast/pad
    assert x2d.shape[1] == IN_FEATURES

    # Balanced batch tiling: >= 2 tiles when B > 16 (both v7x TensorCores get
    # work under dimension_semantics=("parallel",)); TB rounded up to the
    # sublane multiple of 8. The ragged tail of the last tile is handled by
    # Pallas OOB masking (reads undefined / writes dropped) -- rows are
    # independent, so no wrapper-side padding is needed.
    if B <= 16:
        num_tiles = 1
    else:
        num_tiles = max(2, pl.cdiv(B, MAX_TB))
    tb = _round_up(pl.cdiv(B, num_tiles), 8)
    num_tiles = pl.cdiv(B, tb)
    grid = (num_tiles,)

    flops = 2 * B * IN_FEATURES * HIDDEN + 2 * B * HIDDEN * HEAD_N + 8 * B * HIDDEN
    bytes_accessed = (x2d.size * 4 + w1_bf.size * 2 + b1_2d.size * 4
                      + w2_pad.size * 2 + 4 + B * HEAD_N * 4)

    out = pl.pallas_call(
        _discriminator_kernel,
        out_shape=jax.ShapeDtypeStruct((B, HEAD_N), jnp.float32),
        grid=grid,
        in_specs=[
            pl.BlockSpec((tb, IN_FEATURES), lambda i: (i, 0)),        # x tile (f32, cast in-kernel)
            pl.BlockSpec((IN_FEATURES, HIDDEN), lambda i: (0, 0)),    # W1: constant index -> resident
            pl.BlockSpec((1, HIDDEN), lambda i: (0, 0)),              # b1 resident
            pl.BlockSpec((HIDDEN, HEAD_N), lambda i: (0, 0)),         # w2 (padded) resident
            pl.BlockSpec(memory_space=pltpu.MemorySpace.SMEM),        # b2 scalar
        ],
        out_specs=pl.BlockSpec((tb, HEAD_N), lambda i: (i, 0)),       # lane-dense output block
        compiler_params=pltpu.CompilerParams(
            dimension_semantics=("parallel",),
            vmem_limit_bytes=32 * 1024 * 1024,
        ),
        cost_estimate=pl.CostEstimate(
            flops=flops,
            transcendentals=B * (HEAD_N + 1),
            bytes_accessed=bytes_accessed,
        ),
    )(x2d, w1_bf, b1_2d, w2_pad, b2_1d)

    # Column 0 of the lane-dense (B, 128) output holds the real probability.
    return out[:, :1]


def init_params(key):
    """Deterministic init mimicking nn.Linear's U(-1/sqrt(fan_in), 1/sqrt(fan_in))."""
    k1, k2, k3, k4 = jax.random.split(key, 4)
    lim1 = 1.0 / jnp.sqrt(IN_FEATURES)
    lim2 = 1.0 / jnp.sqrt(HIDDEN)
    w1 = jax.random.uniform(k1, (IN_FEATURES, HIDDEN), jnp.float32, -lim1, lim1)
    b1 = jax.random.uniform(k2, (HIDDEN,), jnp.float32, -lim1, lim1)
    w2 = jax.random.uniform(k3, (HIDDEN, 1), jnp.float32, -lim2, lim2)
    b2 = jax.random.uniform(k4, (1,), jnp.float32, -lim2, lim2)
    return w1, b1, w2, b2


def _reference_forward(x, w1, b1, w2, b2):
    """Pure-JAX reference mirroring the kernel's bf16 MXU operands / f32 math."""
    B = x.shape[0]
    x2d = x.reshape(B, -1)
    h = jnp.dot(x2d.astype(jnp.bfloat16), w1.astype(jnp.bfloat16),
                preferred_element_type=jnp.float32) + b1
    mean = jnp.mean(h, axis=-1, keepdims=True)
    var = jnp.mean((h - mean) ** 2, axis=-1, keepdims=True)
    hn = (h - mean) / jnp.sqrt(var + EPS)
    ha = jnp.where(hn >= 0, hn, NEG_SLOPE * hn)
    logit = jnp.dot(ha.astype(jnp.bfloat16), w2.astype(jnp.bfloat16),
                    preferred_element_type=jnp.float32) + b2
    return jax.nn.sigmoid(logit)


if __name__ == "__main__":
    key = jax.random.PRNGKey(0)
    k_x, k_p, k_x2 = jax.random.split(key, 3)

    # Small shape consistent with the module: base_model output (B, 512, 1, 1).
    B = 2
    x = jax.random.normal(k_x, (B, IN_FEATURES, 1, 1), jnp.float32)
    w1, b1, w2, b2 = init_params(k_p)
    params = prepare_params(w1, b1, w2, b2)   # one-time bf16 cast / lane pad

    out = jax.block_until_ready(discriminator_forward(x, params))
    ref = _reference_forward(x, w1, b1, w2, b2)
    assert out.shape == (B, 1)
    assert jnp.allclose(out, ref, atol=2e-3, rtol=2e-3)

    # Ragged batch: exercises balanced tiling (two TB=152 tiles, grid=(2,))
    # and the OOB-masked last tile without any wrapper-side padding.
    B2 = 300
    x2 = jax.random.normal(k_x2, (B2, IN_FEATURES, 1, 1), jnp.float32)
    out2 = jax.block_until_ready(discriminator_forward(x2, params))
    ref2 = _reference_forward(x2, w1, b1, w2, b2)
    assert out2.shape == (B2, 1)
    assert jnp.allclose(out2, ref2, atol=2e-3, rtol=2e-3)

    print("KERNEL_OK")
</pallas_src>

<mosaic_0001>
module attributes {stable_mosaic.version = 11 : i64} {
  func.func @_discriminator_kernel(%arg0: i32, %arg1: memref<8x512xf32, #tpu.memory_space<vmem>>, %arg2: memref<512x1024xbf16, #tpu.memory_space<vmem>>, %arg3: memref<1x1024xf32, #tpu.memory_space<vmem>>, %arg4: memref<1024x128xbf16, #tpu.memory_space<vmem>>, %arg5: memref<1xf32, #tpu.memory_space<smem>>, %arg6: memref<8x128xf32, #tpu.memory_space<vmem>>) attributes {dimension_semantics = [#tpu.dimension_semantics<parallel>], iteration_bounds = array<i64: 1>, scalar_prefetch = 0 : i64, scratch_operands = 0 : i64, tpu.core_type = #tpu.core_type<tc>, window_params = [{transform_indices = @transform_0, window_bounds = array<i64: 8, 512>}, {pipeline_mode = #tpu.pipeline_mode<synchronous>, transform_indices = @transform_1, window_bounds = array<i64: 512, 1024>}, {pipeline_mode = #tpu.pipeline_mode<synchronous>, transform_indices = @transform_2, window_bounds = array<i64: 1, 1024>}, {pipeline_mode = #tpu.pipeline_mode<synchronous>, transform_indices = @transform_3, window_bounds = array<i64: 1024, 128>}, {transform_indices = @transform_4, window_bounds = array<i64: 1>}, {transform_indices = @transform_5, window_bounds = array<i64: 8, 128>}]} {
    %c0 = arith.constant 0 : index
    %c0_0 = arith.constant 0 : index
    %0 = vector.load %arg1[%c0, %c0_0] : memref<8x512xf32, #tpu.memory_space<vmem>>, vector<8x512xf32>
    %1 = arith.truncf %0 : vector<8x512xf32> to vector<8x512xbf16>
    %c0_1 = arith.constant 0 : index
    %c0_2 = arith.constant 0 : index
    %2 = vector.load %arg2[%c0_1, %c0_2] : memref<512x1024xbf16, #tpu.memory_space<vmem>>, vector<512x1024xbf16>
    %cst = arith.constant dense<0.000000e+00> : vector<8x1024xf32>
    %3 = tpu.matmul %1, %2, %cst {dimension_numbers = #tpu.dot_dimension_numbers<[1], [0], [0], [1], [0, 0, 1, 1], [], []>} : vector<8x512xbf16>, vector<512x1024xbf16>, vector<8x1024xf32> -> vector<8x1024xf32>
    %c0_3 = arith.constant 0 : index
    %c0_4 = arith.constant 0 : index
    %4 = vector.load %arg3[%c0_3, %c0_4] : memref<1x1024xf32, #tpu.memory_space<vmem>>, vector<1x1024xf32>
    %5 = vector.broadcast %4 : vector<1x1024xf32> to vector<8x1024xf32>
    %6 = arith.addf %3, %5 : vector<8x1024xf32>
    %cst_5 = arith.constant dense<0.000000e+00> : vector<8xf32>
    %7 = vector.multi_reduction <add>, %6, %cst_5 [1] : vector<8x1024xf32> to vector<8xf32>
    %8 = vector.shape_cast %7 : vector<8xf32> to vector<8x1xf32>
    %cst_6 = arith.constant 9.765625E-4 : f32
    %9 = vector.broadcast %cst_6 : f32 to vector<8x1xf32>
    %10 = arith.mulf %8, %9 : vector<8x1xf32>
    %11 = arith.mulf %6, %6 : vector<8x1024xf32>
    %cst_7 = arith.constant dense<0.000000e+00> : vector<8xf32>
    %12 = vector.multi_reduction <add>, %11, %cst_7 [1] : vector<8x1024xf32> to vector<8xf32>
    %13 = vector.shape_cast %12 : vector<8xf32> to vector<8x1xf32>
    %cst_8 = arith.constant 9.765625E-4 : f32
    %14 = vector.broadcast %cst_8 : f32 to vector<8x1xf32>
    %15 = arith.mulf %13, %14 : vector<8x1xf32>
    %16 = arith.mulf %10, %10 : vector<8x1xf32>
    %17 = arith.subf %15, %16 : vector<8x1xf32>
    %cst_9 = arith.constant 0.000000e+00 : f32
    %18 = vector.broadcast %cst_9 : f32 to vector<8x1xf32>
    %19 = arith.maximumf %17, %18 : vector<8x1xf32>
    %20 = vector.broadcast %10 : vector<8x1xf32> to vector<8x1024xf32>
    %21 = arith.subf %6, %20 : vector<8x1024xf32>
    %cst_10 = arith.constant 9.99999974E-6 : f32
    %22 = vector.broadcast %cst_10 : f32 to vector<8x1xf32>
    %23 = arith.addf %19, %22 : vector<8x1xf32>
    %24 = math.rsqrt %23 : vector<8x1xf32>
    %25 = vector.broadcast %24 : vector<8x1xf32> to vector<8x1024xf32>
    %26 = arith.mulf %21, %25 : vector<8x1024xf32>
    %cst_11 = arith.constant 0.00999999977 : f32
    %27 = vector.broadcast %cst_11 : f32 to vector<8x1024xf32>
    %28 = arith.mulf %27, %26 : vector<8x1024xf32>
    %29 = arith.maximumf %26, %28 : vector<8x1024xf32>
    %30 = arith.truncf %29 : vector<8x1024xf32> to vector<8x1024xbf16>
    %c0_12 = arith.constant 0 : index
    %c0_13 = arith.constant 0 : index
    %31 = vector.load %arg4[%c0_12, %c0_13] : memref<1024x128xbf16, #tpu.memory_space<vmem>>, vector<1024x128xbf16>
    %cst_14 = arith.constant dense<0.000000e+00> : vector<8x128xf32>
    %32 = tpu.matmul %30, %31, %cst_14 {dimension_numbers = #tpu.dot_dimension_numbers<[1], [0], [0], [1], [0, 0, 1, 1], [], []>} : vector<8x1024xbf16>, vector<1024x128xbf16>, vector<8x128xf32> -> vector<8x128xf32>
    %c0_15 = arith.constant 0 : index
    %33 = memref.load %arg5[%c0_15] : memref<1xf32, #tpu.memory_space<smem>>
    %34 = vector.broadcast %33 : f32 to vector<8x128xf32>
    %35 = arith.addf %32, %34 : vector<8x128xf32>
    %36 = arith.negf %35 : vector<8x128xf32>
    %37 = math.exp %36 : vector<8x128xf32>
    %cst_16 = arith.constant 1.000000e+00 : f32
    %38 = vector.broadcast %cst_16 : f32 to vector<8x128xf32>
    %39 = arith.addf %38, %37 : vector<8x128xf32>
    %40 = arith.divf %38, %39 : vector<8x128xf32>
    %c0_17 = arith.constant 0 : index
    %c0_18 = arith.constant 0 : index
    %41 = vector.load %arg6[%c0_17, %c0_18] : memref<8x128xf32, #tpu.memory_space<vmem>>, vector<8x128xf32>
    tpu.vector_store %arg6[%c0_17, %c0_18], %40 {strides = array<i32>} : memref<8x128xf32, #tpu.memory_space<vmem>>, vector<8x128xf32>,
    return
  }
  func.func @transform_0(%arg0: i32) -> (i32, i32) {
    %c0_i32 = arith.constant 0 : i32
    %c0_i32_0 = arith.constant 0 : i32
    return %arg0, %c0_i32 : i32, i32
  }
  func.func @transform_1(%arg0: i32) -> (i32, i32) {
    %c0_i32 = arith.constant 0 : i32
    %c0_i32_0 = arith.constant 0 : i32
    %c0_i32_1 = arith.constant 0 : i32
    return %c0_i32, %c0_i32_0 : i32, i32
  }
  func.func @transform_2(%arg0: i32) -> (i32, i32) {
    %c0_i32 = arith.constant 0 : i32
    %c0_i32_0 = arith.constant 0 : i32
    %c0_i32_1 = arith.constant 0 : i32
    return %c0_i32, %c0_i32_0 : i32, i32
  }
  func.func @transform_3(%arg0: i32) -> (i32, i32) {
    %c0_i32 = arith.constant 0 : i32
    %c0_i32_0 = arith.constant 0 : i32
    %c0_i32_1 = arith.constant 0 : i32
    return %c0_i32, %c0_i32_0 : i32, i32
  }
  func.func @transform_4(%arg0: i32) -> i32 {
    %c0_i32 = arith.constant 0 : i32
    %c0_i32_0 = arith.constant 0 : i32
    return %c0_i32 : i32
  }
  func.func @transform_5(%arg0: i32) -> (i32, i32) {
    %c0_i32 = arith.constant 0 : i32
    %c0_i32_0 = arith.constant 0 : i32
    return %arg0, %c0_i32 : i32, i32
  }
}

</mosaic_0001>

<bundles_post_ra>
// kernel: tpu_custom_call.1
= control target key start
LH: loop header
LB: loop body
LE: loop exit
PB: predicated region body
PF: predicated region fallthrough
CT: control target
= control target key end

     0   :  { %11 = vsyncpa [#allocation4], 0  ;;  %s4741_s0 = inlined_call_operand.hbm [shape: f32[2,512], index: 0, kind: input, shape index: {}]   ;;  %s4742_s1 = inlined_call_operand.hbm [shape: bf16[512,1024], index: 1, kind: input, shape index: {}]   ;;  %s4743_s2 = inlined_call_operand.hbm [shape: f32[1,1024], index: 2, kind: input, shape index: {}]   ;;  %s4744_s3 = inlined_call_operand.hbm [shape: bf16[1024,128], index: 3, kind: input, shape index: {}]   ;;  %s4745_s4 = inlined_call_operand.<no memory space> [shape: f32[1], index: 4, kind: input, shape index: {}]   ;;  %s4746_s5 = inlined_call_operand.hbm [shape: f32[2,128], index: 5, kind: output, shape index: {}]  }
   0x1   :  { %12 = vsyncpa [#allocation7], 0 }
   0x2   :  { %13 = vsyncpa [#allocation10], 0 }
   0x3   :  { %14 = vsyncpa [#allocation5], 0  ;;  %s32_s20 = sshll.u32 %s4742_s1, 4  ;;  %s33_s20 = int_to_ptr.hbm [resolvable:$true] %s32_s20 }
   0x4   :  { %18 = vsyncadd [#allocation4], 384  ;;  %s4568_s21 = smov [#allocation6]   ;;  %s19_s25 = sshll.u32 %s4741_s0, 4  ;;  %s20_s25 = int_to_ptr.hbm [resolvable:$true] %s19_s25 }
   0x5   :  { %s34_s22 = sshll.u32 %s4568_s21, 4  ;;  %s4569_s26 = smov 512   ;;  %s35_s22 = int_to_ptr.vmem [resolvable:$true] %s34_s22 }
   0x6   :  { %s4570_s27 = smov 32   ;;  %s4571_s28 = smov [#allocation3]  }
   0x7   :  { %40 = dma.hbm_to_vmem [thread:$0]  %s33_s20, 32768, %s35_s22, [#allocation7], %s4569_s26, %s4569_s26, %s4570_s27  }
   0x8   :  { %s21_s29 = sshll.u32 %s4571_s28, 4  ;;  %s4572_s30 = smov 128   ;;  %s22_s29 = int_to_ptr.vmem [resolvable:$true] %s21_s29 }
   0x9   :  { %s4573_s6 = smov 8   ;;  %s46_s8 = sshll.u32 %s4743_s2, 4  ;;  %s47_s8 = int_to_ptr.hbm [resolvable:$true] %s46_s8 }
   0xa   :  { %27 = dma.hbm_to_vmem [thread:$0]  %s20_s25, 128, %s22_s29, [#allocation4], %s4572_s30, %s4572_s30, %s4573_s6  }
   0xb   :  { %s4574_s9 = smov [#allocation8]   ;;  %s56_s12 = sshll.u32 %s4744_s3, 4  ;;  %s57_s12 = int_to_ptr.hbm [resolvable:$true] %s56_s12 }
   0xc   :  { %s48_s10 = sshll.u32 %s4574_s9, 4  ;;  %s4575_s13 = smov [#allocation9]   ;;  %s49_s10 = int_to_ptr.vmem [resolvable:$true] %s48_s10 }
   0xd   :  { %51 = dma.hbm_to_vmem [thread:$0]  %s47_s8, 128, %s49_s10, [#allocation7]  }
   0xe   :  { %s58_s14 = sshll.u32 %s4575_s13, 4  ;;  %s4576_s15 = smov 64   ;;  %s59_s14 = int_to_ptr.vmem [resolvable:$true] %s58_s14 }
   0xf   :  { %s4577_s16 = smov 4  }
  0x10   :  { %64 = dma.hbm_to_vmem [thread:$0]  %s57_s12, 8192, %s59_s14, [#allocation10], %s4576_s15, %s4576_s15, %s4577_s16  }
  0x11   :  { %4560 = dma.done.wait [#allocation4], 512  }
  0x12   :  { %4561 = vsyncadd [#allocation4], 4294966784 }
  0x13   :  { %4562 = dma.done.wait [#allocation7], 32896  }
  0x14   :  { %4563 = vsyncadd [#allocation7], 4294934400 }
  0x15   :  { %4564 = dma.done.wait [#allocation10], 8192  }
  0x16   :  { %4565 = vsyncadd [#allocation10], 4294959104  ;;  %v3047_v0 = vld [vmem:[#allocation6 + $0x1c0] sm:$0xf] }
  0x17   :  { %v4162_v1 = vld [vmem:[#allocation6 + $0x1dc] sm:$0xf0] }
  0x18   :  { %v3303_v2 = vld [vmem:[#allocation6 + $0x3c0] sm:$0xf]  ;;  %v3048_v3 = vor.u32 %v4162_v1, %v3047_v0 }
  0x19   :  { %v4226_v4 = vld [vmem:[#allocation6 + $0x3dc] sm:$0xf0] }
  0x1a   :  { %v3559_v5 = vld [vmem:[#allocation6 + $0x5c0] sm:$0xf]  ;;  %v3304_v7 = vor.u32 %v4226_v4, %v3303_v2  ;;  %1664 = vmatpush.bf16.msra.mxu0 %v3048_v3 }
  0x1b   :  { %v4290_v6 = vld [vmem:[#allocation6 + $0x5dc] sm:$0xf0] }
  0x1c   :  { %v3560_v8 = vor.u32 %v4290_v6, %v3559_v5  ;;  %v3815_v9 = vld [vmem:[#allocation6 + $0x7c0] sm:$0xf]  ;;  %1677 = vmatpush.bf16.msra.mxu1 %v3304_v7 }
  0x1d   :  { %v4354_v10 = vld [vmem:[#allocation6 + $0x7dc] sm:$0xf0] }
  0x1e   :  { %v3015_v11 = vld [vmem:[#allocation6 + $0x180] sm:$0xf]  ;;  %v3816_v12 = vor.u32 %v4354_v10, %v3815_v9  ;;  %1690 = vmatpush.bf16.msra.mxu2 %v3560_v8 }
  0x1f   :  { %v4154_v13 = vld [vmem:[#allocation6 + $0x19c] sm:$0xf0] }
  0x20   :  { %v3271_v14 = vld [vmem:[#allocation6 + $0x380] sm:$0xf]  ;;  %v3016_v16 = vor.u32 %v4154_v13, %v3015_v11  ;;  %1703 = vmatpush.bf16.msra.mxu3 %v3816_v12 }
  0x21   :  { %v4218_v15 = vld [vmem:[#allocation6 + $0x39c] sm:$0xf0] }
  0x22   :  { %v3272_v17 = vor.u32 %v4218_v15, %v3271_v14  ;;  %v3527_v18 = vld [vmem:[#allocation6 + $0x580] sm:$0xf]  ;;  %1665 = vmatpush.bf16.msra.mxu0 %v3016_v16 }
  0x23   :  { %v4282_v19 = vld [vmem:[#allocation6 + $0x59c] sm:$0xf0] }
  0x24   :  { %v3783_v20 = vld [vmem:[#allocation6 + $0x780] sm:$0xf]  ;;  %v3528_v21 = vor.u32 %v4282_v19, %v3527_v18  ;;  %1678 = vmatpush.bf16.msra.mxu1 %v3272_v17 }
  0x25   :  { %v4346_v22 = vld [vmem:[#allocation6 + $0x79c] sm:$0xf0] }
  0x26   :  { %v2983_v23 = vld [vmem:[#allocation6 + $0x140] sm:$0xf]  ;;  %v3784_v25 = vor.u32 %v4346_v22, %v3783_v20  ;;  %1691 = vmatpush.bf16.msra.mxu2 %v3528_v21 }
  0x27   :  { %v4146_v24 = vld [vmem:[#allocation6 + $0x15c] sm:$0xf0] }
  0x28   :  { %v3239_v26 = vld [vmem:[#allocation6 + $0x340] sm:$0xf]  ;;  %v2984_v29 = vor.u32 %v4146_v24, %v2983_v23  ;;  %1704 = vmatpush.bf16.msra.mxu3 %v3784_v25 }
  0x29   :  { %v4210_v27 = vld [vmem:[#allocation6 + $0x35c] sm:$0xf0] }
  0x2a   :  { %v3495_v28 = vld [vmem:[#allocation6 + $0x540] sm:$0xf]  ;;  %v3240_v33 = vor.u32 %v4210_v27, %v3239_v26  ;;  %1666 = vmatpush.bf16.msra.mxu0 %v2984_v29  ;;  %v3049_v29 = vld [vmem:[#allocation6 + $0x1e0] sm:$0xf0] }
  0x2b   :  { %v4274_v30 = vld [vmem:[#allocation6 + $0x55c] sm:$0xf0] }
  0x2c   :  { %v3751_v31 = vld [vmem:[#allocation6 + $0x740] sm:$0xf]  ;;  %v3496_v34 = vor.u32 %v4274_v30, %v3495_v28  ;;  %1679 = vmatpush.bf16.msra.mxu1 %v3240_v33  ;;  %v4158_v28 = vld [vmem:[#allocation6 + $0x1c4] sm:$0xf] }
  0x2d   :  { %v4338_v32 = vld [vmem:[#allocation6 + $0x75c] sm:$0xf0]  ;;  %v4222_v30 = vld [vmem:[#allocation6 + $0x3c4] sm:$0xf] }
  0x2e   :  { %v2951_v35 = vld [vmem:[#allocation6 + $0x100] sm:$0xf]  ;;  %v3752_v38 = vor.u32 %v4338_v32, %v3751_v31  ;;  %1692 = vmatpush.bf16.msra.mxu2 %v3496_v34  ;;  %v3305_v32 = vld [vmem:[#allocation6 + $0x3e0] sm:$0xf0] }
  0x2f   :  { %v4138_v36 = vld [vmem:[#allocation6 + $0x11c] sm:$0xf0]  ;;  %v4286_v33 = vld [vmem:[#allocation6 + $0x5c4] sm:$0xf] }
  0x30   :  { %v3207_v37 = vld [vmem:[#allocation6 + $0x300] sm:$0xf]  ;;  %v2952_v44 = vor.u32 %v4138_v36, %v2951_v35  ;;  %1705 = vmatpush.bf16.msra.mxu3 %v3752_v38  ;;  %v3561_v34 = vld [vmem:[#allocation6 + $0x5e0] sm:$0xf0] }
  0x31   :  { %v4202_v39 = vld [vmem:[#allocation6 + $0x31c] sm:$0xf0]  ;;  %v3817_v38 = vld [vmem:[#allocation6 + $0x7e0] sm:$0xf0] }
  0x32   :  { %v3463_v40 = vld [vmem:[#allocation6 + $0x500] sm:$0xf]  ;;  %v3208_v45 = vor.u32 %v4202_v39, %v3207_v37  ;;  %1667 = vmatpush.bf16.msra.mxu0 %v2952_v44  ;;  %v4350_v37 = vld [vmem:[#allocation6 + $0x7c4] sm:$0xf]  ;;  %v3564_v44 = vor.u32 %v4286_v33, %v3561_v34 }
  0x33   :  { %v4266_v41 = vld [vmem:[#allocation6 + $0x51c] sm:$0xf0] }
  0x34   :  { %v3719_v42 = vld [vmem:[#allocation6 + $0x700] sm:$0xf]  ;;  %v3464_v46 = vor.u32 %v4266_v41, %v3463_v40  ;;  %1680 = vmatpush.bf16.msra.mxu1 %v3208_v45  ;;  %v3052_v40 = vor.u32 %v4158_v28, %v3049_v29  ;;  %v4150_v41 = vld [vmem:[#allocation6 + $0x184] sm:$0xf] }
  0x35   :  { %v4330_v43 = vld [vmem:[#allocation6 + $0x71c] sm:$0xf0]  ;;  %v4214_v45 = vld [vmem:[#allocation6 + $0x384] sm:$0xf] }
  0x36   :  { %v2919_v47 = vld [vmem:[#allocation6 + $0xc0] sm:$0xf]  ;;  %v3720_v50 = vor.u32 %v4330_v43, %v3719_v42  ;;  %1693 = vmatpush.bf16.msra.mxu2 %v3464_v46  ;;  %v3017_v42 = vld [vmem:[#allocation6 + $0x1a0] sm:$0xf0]  ;;  %v3308_v43 = vor.u32 %v4222_v30, %v3305_v32 }
  0x37   :  { %v4130_v48 = vld [vmem:[#allocation6 + $0xdc] sm:$0xf0]  ;;  %v3273_v46 = vld [vmem:[#allocation6 + $0x3a0] sm:$0xf0] }
  0x38   :  { %v3175_v49 = vld [vmem:[#allocation6 + $0x2c0] sm:$0xf]  ;;  %v2920_v56 = vor.u32 %v4130_v48, %v2919_v47  ;;  %1706 = vmatpush.bf16.msra.mxu3 %v3720_v50  ;;  %v4278_v47 = vld [vmem:[#allocation6 + $0x584] sm:$0xf]  ;;  %v3820_v48 = vor.u32 %v4350_v37, %v3817_v38 }
  0x39   :  { %v4194_v51 = vld [vmem:[#allocation6 + $0x2dc] sm:$0xf0]  ;;  %v4342_v50 = vld [vmem:[#allocation6 + $0x784] sm:$0xf] }
  0x3a   :  { %v3431_v52 = vld [vmem:[#allocation6 + $0x4c0] sm:$0xf]  ;;  %v3176_v57 = vor.u32 %v4194_v51, %v3175_v49  ;;  %1668 = vmatpush.bf16.msra.mxu0 %v2920_v56  ;;  %v3529_v49 = vld [vmem:[#allocation6 + $0x5a0] sm:$0xf0]  ;;  %v3020_v56 = vor.u32 %v4150_v41, %v3017_v42 }
  0x3b   :  { %v4258_v53 = vld [vmem:[#allocation6 + $0x4dc] sm:$0xf0]  ;;  %v3785_v51 = vld [vmem:[#allocation6 + $0x7a0] sm:$0xf0] }
  0x3c   :  { %v3687_v54 = vld [vmem:[#allocation6 + $0x6c0] sm:$0xf]  ;;  %v3432_v58 = vor.u32 %v4258_v53, %v3431_v52  ;;  %1681 = vmatpush.bf16.msra.mxu1 %v3176_v57  ;;  %v4142_v52 = vld [vmem:[#allocation6 + $0x144] sm:$0xf] }
  0x3d   :  { %v4322_v55 = vld [vmem:[#allocation6 + $0x6dc] sm:$0xf0]  ;;  %v2985_v57 = vld [vmem:[#allocation6 + $0x160] sm:$0xf0] }
  0x3e   :  { %v2887_v59 = vld [vmem:[#allocation6 + $0x80] sm:$0xf]  ;;  %v3688_v62 = vor.u32 %v4322_v55, %v3687_v54  ;;  %1694 = vmatpush.bf16.msra.mxu2 %v3432_v58  ;;  %v84_v54 = vld [vmem:[#allocation3 + $0x8] sm:$0xff]  ;;  %v85_v55 = vld [vmem:[#allocation3 + $0x10] sm:$0xff] }
  0x3f   :  { %v4122_v60 = vld [vmem:[#allocation6 + $0x9c] sm:$0xf0]  ;;  %v86_v58 = vld [vmem:[#allocation3 + $0x18] sm:$0xff]  ;;  %93 = vst [vmem:[#allocation1 + $0x1] ss:$4 sm:$0xff] %v84_v54 }
  0x40   :  { %v3143_v61 = vld [vmem:[#allocation6 + $0x280] sm:$0xf]  ;;  %v2888_v4 = vor.u32 %v4122_v60, %v2887_v59  ;;  %1707 = vmatpush.bf16.msra.mxu3 %v3688_v62  ;;  %v3276_v59 = vor.u32 %v4214_v45, %v3273_v46  ;;  %v3532_v60 = vor.u32 %v4278_v47, %v3529_v49  ;;  %v3241_v62 = vld [vmem:[#allocation6 + $0x360] sm:$0xf0]  ;;  %95 = vst [vmem:[#allocation1 + $0x2] ss:$4 sm:$0xff] %v85_v55 }
  0x41   :  { %v4186_v63 = vld [vmem:[#allocation6 + $0x29c] sm:$0xf0]  ;;  %97 = vst [vmem:[#allocation1 + $0x3] ss:$4 sm:$0xff] %v86_v58  ;;  %v4182_v41 = vld [vmem:[#allocation6 + $0x284] sm:$0xf] }
  0x42   :  { %v3399_v0 = vld [vmem:[#allocation6 + $0x480] sm:$0xf]  ;;  %v3144_v5 = vor.u32 %v4186_v63, %v3143_v61  ;;  %1669 = vmatpush.bf16.msra.mxu0 %v2888_v4  ;;  %v4206_v61 = vld [vmem:[#allocation6 + $0x344] sm:$0xf]  ;;  %v3788_v63 = vor.u32 %v4342_v50, %v3785_v51  ;;  %v2988_v4 = vor.u32 %v4142_v52, %v2985_v57 }
  0x43   :  { %v4250_v1 = vld [vmem:[#allocation6 + $0x49c] sm:$0xf0]  ;;  %v3401_v45 = vld [vmem:[#allocation6 + $0x4a0] sm:$0xf0] }
  0x44   :  { %v3655_v2 = vld [vmem:[#allocation6 + $0x680] sm:$0xf]  ;;  %v3400_v6 = vor.u32 %v4250_v1, %v3399_v0  ;;  %1682 = vmatpush.bf16.msra.mxu1 %v3144_v5  ;;  %v4270_v0 = vld [vmem:[#allocation6 + $0x544] sm:$0xf] }
  0x45   :  { %v4314_v3 = vld [vmem:[#allocation6 + $0x69c] sm:$0xf0]  ;;  %v3497_v1 = vld [vmem:[#allocation6 + $0x560] sm:$0xf0] }
  0x46   :  { %v2855_v7 = vld [vmem:[#allocation6 + $0x40] sm:$0xf]  ;;  %v3656_v10 = vor.u32 %v4314_v3, %v3655_v2  ;;  %1695 = vmatpush.bf16.msra.mxu2 %v3400_v6  ;;  %v4334_v2 = vld [vmem:[#allocation6 + $0x744] sm:$0xf]  ;;  %v3244_v6 = vor.u32 %v4206_v61, %v3241_v62 }
  0x47   :  { %v4114_v8 = vld [vmem:[#allocation6 + $0x5c] sm:$0xf0]  ;;  %v3753_v3 = vld [vmem:[#allocation6 + $0x760] sm:$0xf0] }
  0x48   :  { %v3111_v9 = vld [vmem:[#allocation6 + $0x240] sm:$0xf]  ;;  %v2856_v16 = vor.u32 %v4114_v8, %v2855_v7  ;;  %1708 = vmatpush.bf16.msra.mxu3 %v3656_v10  ;;  %v4134_v5 = vld [vmem:[#allocation6 + $0x104] sm:$0xf]  ;;  %v3500_v7 = vor.u32 %v4270_v0, %v3497_v1 }
  0x49   :  { %v4178_v11 = vld [vmem:[#allocation6 + $0x25c] sm:$0xf0]  ;;  %v2953_v8 = vld [vmem:[#allocation6 + $0x120] sm:$0xf0] }
  0x4a   :  { %v3367_v12 = vld [vmem:[#allocation6 + $0x440] sm:$0xf]  ;;  %v3112_v19 = vor.u32 %v4178_v11, %v3111_v9  ;;  %1670 = vmatpush.bf16.msra.mxu0 %v2856_v16  ;;  %v4198_v9 = vld [vmem:[#allocation6 + $0x304] sm:$0xf]  ;;  %v3756_v11 = vor.u32 %v4334_v2, %v3753_v3 }
  0x4b   :  { %v4242_v13 = vld [vmem:[#allocation6 + $0x45c] sm:$0xf0]  ;;  %v3209_v10 = vld [vmem:[#allocation6 + $0x320] sm:$0xf0] }
  0x4c   :  { %v3623_v14 = vld [vmem:[#allocation6 + $0x640] sm:$0xf]  ;;  %v3368_v20 = vor.u32 %v4242_v13, %v3367_v12  ;;  %1683 = vmatpush.bf16.msra.mxu1 %v3112_v19  ;;  %v4262_v12 = vld [vmem:[#allocation6 + $0x504] sm:$0xf] }
  0x4d   :  { %v4306_v15 = vld [vmem:[#allocation6 + $0x65c] sm:$0xf0]  ;;  %v3465_v13 = vld [vmem:[#allocation6 + $0x520] sm:$0xf0] }
  0x4e   :  { %v2823_v17 = vld [vmem:[#allocation6] sm:$0xf]  ;;  %v3624_v24 = vor.u32 %v4306_v15, %v3623_v14  ;;  %1696 = vmatpush.bf16.msra.mxu2 %v3368_v20  ;;  %v4326_v14 = vld [vmem:[#allocation6 + $0x704] sm:$0xf] }
  0x4f   :  { %v4106_v18 = vld [vmem:[#allocation6 + $0x1c] sm:$0xf0]  ;;  %v3721_v15 = vld [vmem:[#allocation6 + $0x720] sm:$0xf0] }
  0x50   :  { %v3079_v21 = vld [vmem:[#allocation6 + $0x200] sm:$0xf]  ;;  %v2824_v31 = vor.u32 %v4106_v18, %v2823_v17  ;;  %1709 = vmatpush.bf16.msra.mxu3 %v3624_v24  ;;  %v4126_v16 = vld [vmem:[#allocation6 + $0xc4] sm:$0xf]  ;;  %v2956_v18 = vor.u32 %v4134_v5, %v2953_v8  ;;  %v3055_v8 = vld [vmem:[#allocation6 + $0x1c8] sm:$0xf] }
  0x51   :  { %v4170_v22 = vld [vmem:[#allocation6 + $0x21c] sm:$0xf0]  ;;  %v2921_v17 = vld [vmem:[#allocation6 + $0xe0] sm:$0xf0] }
  0x52   :  { %v3335_v23 = vld [vmem:[#allocation6 + $0x400] sm:$0xf]  ;;  %v3080_v35 = vor.u32 %v4170_v22, %v3079_v21  ;;  %1671 = vmatpush.bf16.msra.mxu0 %v2824_v31  ;;  %v4190_v19 = vld [vmem:[#allocation6 + $0x2c4] sm:$0xf]  ;;  %v3212_v22 = vor.u32 %v4198_v9, %v3209_v10  ;;  %v2924_v34 = vor.u32 %v4126_v16, %v2921_v17  ;;  %v4163_v9 = vld [vmem:[#allocation6 + $0x1e4] sm:$0xf0] }
  0x53   :  { %v4234_v25 = vld [vmem:[#allocation6 + $0x41c] sm:$0xf0]  ;;  %v3177_v20 = vld [vmem:[#allocation6 + $0x2e0] sm:$0xf0]  ;;  %v3311_v10 = vld [vmem:[#allocation6 + $0x3c8] sm:$0xf] }
  0x54   :  { %v3591_v26 = vld [vmem:[#allocation6 + $0x600] sm:$0xf]  ;;  %v3336_v36 = vor.u32 %v4234_v25, %v3335_v23  ;;  %1684 = vmatpush.bf16.msra.mxu1 %v3080_v35  ;;  %v4254_v21 = vld [vmem:[#allocation6 + $0x4c4] sm:$0xf]  ;;  %v3468_v23 = vor.u32 %v4262_v12, %v3465_v13  ;;  %v3180_v37 = vor.u32 %v4190_v19, %v3177_v20  ;;  %v4227_v12 = vld [vmem:[#allocation6 + $0x3e4] sm:$0xf0]  ;;  %v3056_v20 = vor.u32 %v4163_v9, %v3055_v8 }
  0x55   :  { %v4298_v27 = vld [vmem:[#allocation6 + $0x61c] sm:$0xf0]  ;;  %v3433_v24 = vld [vmem:[#allocation6 + $0x4e0] sm:$0xf0]  ;;  %v3567_v13 = vld [vmem:[#allocation6 + $0x5c8] sm:$0xf] }
  0x56   :  { %v3592_v39 = vor.u32 %v4298_v27, %v3591_v26  ;;  %1697 = vmatpush.bf16.msra.mxu2 %v3336_v36  ;;  %v83_v53 = vld [vmem:[#allocation3] sm:$0xff]  ;;  %1716 = vmatpush.bf16.msrb.mxu0 %v3052_v40  ;;  %v3724_v27 = vor.u32 %v4326_v14, %v3721_v15  ;;  %v3436_v38 = vor.u32 %v4254_v21, %v3433_v24  ;;  %v4291_v14 = vld [vmem:[#allocation6 + $0x5e4] sm:$0xf0] }
  0x57   :  { %91 = vst [vmem:[#allocation1] ss:$4 sm:$0xff] %v83_v53  ;;  %v4318_v25 = vld [vmem:[#allocation6 + $0x6c4] sm:$0xf]  ;;  %v3823_v17 = vld [vmem:[#allocation6 + $0x7c8] sm:$0xf]  ;;  %v3312_v21 = vor.u32 %v4227_v12, %v3311_v10 }
  0x58   :  { %1710 = vmatpush.bf16.msra.mxu3 %v3592_v39  ;;  %1729 = vmatpush.bf16.msrb.mxu1 %v3308_v43  ;;  %v3689_v26 = vld [vmem:[#allocation6 + $0x6e0] sm:$0xf0]  ;;  %v4155_v24 = vld [vmem:[#allocation6 + $0x1a4] sm:$0xf0] }
  0x59   :  { %v4118_v39 = vld [vmem:[#allocation6 + $0x84] sm:$0xf]  ;;  %v3692_v42 = vor.u32 %v4318_v25, %v3689_v26  ;;  %v3279_v25 = vld [vmem:[#allocation6 + $0x388] sm:$0xf] }
  0x5a   :  { %1742 = vmatpush.bf16.msrb.mxu2 %v3564_v44  ;;  %1717 = vmatpush.bf16.msrb.mxu0 %v3020_v56  ;;  %v2889_v40 = vld [vmem:[#allocation6 + $0xa0] sm:$0xf0]  ;;  %v4123_v12 = vld [vmem:[#allocation6 + $0xa4] sm:$0xf0] }
  0x5b   :  { %v3145_v43 = vld [vmem:[#allocation6 + $0x2a0] sm:$0xf0] }
  0x5c   :  { %1755 = vmatpush.bf16.msrb.mxu3 %v3820_v48  ;;  %1730 = vmatpush.bf16.msrb.mxu1 %v3276_v59  ;;  %v4246_v44 = vld [vmem:[#allocation6 + $0x484] sm:$0xf]  ;;  %v2892_v48 = vor.u32 %v4118_v39, %v2889_v40  ;;  %v3148_v49 = vor.u32 %v4182_v41, %v3145_v43  ;;  %v2991_v39 = vld [vmem:[#allocation6 + $0x148] sm:$0xf] }
  0x5d   :  { %v4310_v46 = vld [vmem:[#allocation6 + $0x684] sm:$0xf]  ;;  %v3404_v50 = vor.u32 %v4246_v44, %v3401_v45  ;;  %v4147_v40 = vld [vmem:[#allocation6 + $0x164] sm:$0xf0] }
  0x5e   :  { %1743 = vmatpush.bf16.msrb.mxu2 %v3532_v60  ;;  %1718 = vmatpush.bf16.msrb.mxu0 %v2988_v4  ;;  %v100_v28 = vld.sshfl [vmem:[#allocation1 + $0x10] sm:$0xff pattern:$0x73625140]  ;;  %v98_v29 = vld.sshfl [vmem:[#allocation1] sm:$0xff pattern:$0x73625140] }
  0x5f   :  { %v4623_v30 = vpack.c.bf16 %v100_v28, %v100_v28  ;;  %v4625_v31 = vpack.c.bf16 %v98_v29, %v98_v29  ;;  %v101_v32 = vld.sshfl [vmem:[#allocation1 + $0x18] sm:$0xff pattern:$0x73625140]  ;;  %v99_v33 = vld.sshfl [vmem:[#allocation1 + $0x8] sm:$0xff pattern:$0x73625140] }
  0x60   :  { %1756 = vmatpush.bf16.msrb.mxu3 %v3788_v63  ;;  %1731 = vmatpush.bf16.msrb.mxu1 %v3244_v6  ;;  %v4627_v35 = vpack.c.bf16 %v101_v32, %v101_v32  ;;  %v4629_v36 = vpack.c.bf16 %v99_v33, %v99_v33  ;;  %v3657_v47 = vld [vmem:[#allocation6 + $0x6a0] sm:$0xf0]  ;;  %v3535_v28 = vld [vmem:[#allocation6 + $0x588] sm:$0xf] }
  0x61   :  { %1698 = vmatmul.bf16.vlgmr.msra.gmra.mxu2 %v4623_v30  ;;  %1672 = vmatmul.bf16.vlgmr.msra.gmra.mxu0 %v4625_v31  ;;  %v4110_v51 = vld [vmem:[#allocation6 + $0x44] sm:$0xf]  ;;  %v3660_v54 = vor.u32 %v4310_v46, %v3657_v47  ;;  %v4283_v29 = vld [vmem:[#allocation6 + $0x5a4] sm:$0xf0] }
  0x62   :  { %1744 = vmatpush.bf16.msrb.mxu2 %v3500_v7  ;;  %1719 = vmatpush.bf16.msrb.mxu0 %v2956_v18  ;;  %v2857_v52 = vld [vmem:[#allocation6 + $0x60] sm:$0xf0]  ;;  %v4355_v18 = vld [vmem:[#allocation6 + $0x7e4] sm:$0xf0] }
  0x63   :  { %1711 = vmatmul.bf16.vlgmr.msra.gmra.mxu3 %v4627_v35  ;;  %1685 = vmatmul.bf16.vlgmr.msra.gmra.mxu1 %v4629_v36  ;;  %v4174_v53 = vld [vmem:[#allocation6 + $0x244] sm:$0xf]  ;;  %v2860_v60 = vor.u32 %v4110_v51, %v2857_v52  ;;  %v3824_v26 = vor.u32 %v4355_v18, %v3823_v17  ;;  %v3791_v32 = vld [vmem:[#allocation6 + $0x788] sm:$0xf] }
  0x64   :  { %1757 = vmatpush.bf16.msrb.mxu3 %v3756_v11  ;;  %1732 = vmatpush.bf16.msrb.mxu1 %v3212_v22  ;;  %v3113_v55 = vld [vmem:[#allocation6 + $0x260] sm:$0xf0]  ;;  %v3568_v22 = vor.u32 %v4291_v14, %v3567_v13  ;;  %v4347_v33 = vld [vmem:[#allocation6 + $0x7a4] sm:$0xf0] }
  0x65   :  { %v4238_v56 = vld [vmem:[#allocation6 + $0x444] sm:$0xf]  ;;  %v3116_v63 = vor.u32 %v4174_v53, %v3113_v55  ;;  %v3247_v41 = vld [vmem:[#allocation6 + $0x348] sm:$0xf] }
  0x66   :  { %1745 = vmatpush.bf16.msrb.mxu2 %v3468_v23  ;;  %1720 = vmatpush.bf16.msrb.mxu0 %v2924_v34  ;;  %v3369_v57 = vld [vmem:[#allocation6 + $0x460] sm:$0xf0]  ;;  %v3023_v23 = vld [vmem:[#allocation6 + $0x188] sm:$0xf] }
  0x67   :  { %v4302_v58 = vld [vmem:[#allocation6 + $0x644] sm:$0xf]  ;;  %v3372_v0 = vor.u32 %v4238_v56, %v3369_v57  ;;  %v3024_v34 = vor.u32 %v4155_v24, %v3023_v23  ;;  %v4211_v43 = vld [vmem:[#allocation6 + $0x364] sm:$0xf0] }
  0x68   :  { %1758 = vmatpush.bf16.msrb.mxu3 %v3724_v27  ;;  %1733 = vmatpush.bf16.msrb.mxu1 %v3180_v37  ;;  %v3625_v59 = vld [vmem:[#allocation6 + $0x660] sm:$0xf0]  ;;  %v4219_v27 = vld [vmem:[#allocation6 + $0x3a4] sm:$0xf0] }
  0x69   :  { %v4102_v61 = vld [vmem:[#allocation6 + $0x4] sm:$0xf]  ;;  %v3628_v4 = vor.u32 %v4302_v58, %v3625_v59  ;;  %v3280_v37 = vor.u32 %v4219_v27, %v3279_v25  ;;  %v3503_v44 = vld [vmem:[#allocation6 + $0x548] sm:$0xf] }
  0x6a   :  { %1746 = vmatpush.bf16.msrb.mxu2 %v3436_v38  ;;  %1721 = vmatpush.bf16.msrb.mxu0 %v2892_v48  ;;  %v2825_v62 = vld [vmem:[#allocation6 + $0x20] sm:$0xf0]  ;;  %v3536_v38 = vor.u32 %v4283_v29, %v3535_v28  ;;  %v4275_v45 = vld [vmem:[#allocation6 + $0x564] sm:$0xf0]  ;;  %v2992_v48 = vor.u32 %v4147_v40, %v2991_v39 }
  0x6b   :  { %v4166_v1 = vld [vmem:[#allocation6 + $0x204] sm:$0xf]  ;;  %v2828_v11 = vor.u32 %v4102_v61, %v2825_v62  ;;  %v3759_v46 = vld [vmem:[#allocation6 + $0x748] sm:$0xf] }
  0x6c   :  { %1759 = vmatpush.bf16.msrb.mxu3 %v3692_v42  ;;  %1734 = vmatpush.bf16.msrb.mxu1 %v3148_v49  ;;  %v3081_v2 = vld [vmem:[#allocation6 + $0x220] sm:$0xf0]  ;;  %v3792_v42 = vor.u32 %v4347_v33, %v3791_v32  ;;  %v4339_v47 = vld [vmem:[#allocation6 + $0x764] sm:$0xf0]  ;;  %v3248_v49 = vor.u32 %v4211_v43, %v3247_v41 }
  0x6d   :  { %v4230_v3 = vld [vmem:[#allocation6 + $0x404] sm:$0xf]  ;;  %v3084_v15 = vor.u32 %v4166_v1, %v3081_v2  ;;  %v2959_v51 = vld [vmem:[#allocation6 + $0x108] sm:$0xf] }
  0x6e   :  { %1747 = vmatpush.bf16.msrb.mxu2 %v3404_v50  ;;  %v3337_v5 = vld [vmem:[#allocation6 + $0x420] sm:$0xf0]  ;;  %1722 = vmatpush.bf16.msrb.mxu0 %v2860_v60  ;;  %v3504_v50 = vor.u32 %v4275_v45, %v3503_v44  ;;  %v4139_v52 = vld [vmem:[#allocation6 + $0x124] sm:$0xf0] }
  0x6f   :  { %v4294_v6 = vld [vmem:[#allocation6 + $0x604] sm:$0xf]  ;;  %v3340_v16 = vor.u32 %v4230_v3, %v3337_v5  ;;  %v3215_v53 = vld [vmem:[#allocation6 + $0x308] sm:$0xf]  ;;  %v2960_v60 = vor.u32 %v4139_v52, %v2959_v51  ;;  %v3313_v52 = vld [vmem:[#allocation6 + $0x3e8] sm:$0xf0] }
  0x70   :  { %1760 = vmatpush.bf16.msrb.mxu3 %v3660_v54  ;;  %v3593_v7 = vld [vmem:[#allocation6 + $0x620] sm:$0xf0]  ;;  %1735 = vmatpush.bf16.msrb.mxu1 %v3116_v63  ;;  %v3760_v54 = vor.u32 %v4339_v47, %v3759_v46  ;;  %v4203_v55 = vld [vmem:[#allocation6 + $0x324] sm:$0xf0] }
  0x71   :  { %v3596_v19 = vor.u32 %v4294_v6, %v3593_v7  ;;  %v3471_v56 = vld [vmem:[#allocation6 + $0x508] sm:$0xf]  ;;  %v3216_v61 = vor.u32 %v4203_v55, %v3215_v53  ;;  %v4287_v53 = vld [vmem:[#allocation6 + $0x5cc] sm:$0xf] }
  0x72   :  { %1748 = vmatpush.bf16.msrb.mxu2 %v3372_v0  ;;  %1723 = vmatpush.bf16.msrb.mxu0 %v2828_v11  ;;  %v4267_v57 = vld [vmem:[#allocation6 + $0x524] sm:$0xf0] }
  0x73   :  { %v3727_v58 = vld [vmem:[#allocation6 + $0x708] sm:$0xf]  ;;  %v3472_v62 = vor.u32 %v4267_v57, %v3471_v56  ;;  %v4351_v57 = vld [vmem:[#allocation6 + $0x7cc] sm:$0xf] }
  0x74   :  { %1761 = vmatpush.bf16.msrb.mxu3 %v3628_v4  ;;  %1736 = vmatpush.bf16.msrb.mxu1 %v3084_v15  ;;  %v4331_v59 = vld [vmem:[#allocation6 + $0x724] sm:$0xf0] }
  0x75   :  { %1724 = vmatmul.bf16.vlgmr.msrb.gmra.mxu0 %v4625_v31  ;;  %v2927_v63 = vld [vmem:[#allocation6 + $0xc8] sm:$0xf]  ;;  %v3728_v2 = vor.u32 %v4331_v59, %v3727_v58  ;;  %v3825_v58 = vld [vmem:[#allocation6 + $0x7e8] sm:$0xf0] }
  0x76   :  { %1749 = vmatpush.bf16.msrb.mxu2 %v3340_v16  ;;  %1768 = vmatpush.bf16.msra.mxu0 %v3056_v20  ;;  %v4131_v0 = vld [vmem:[#allocation6 + $0xe4] sm:$0xf0] }
  0x77   :  { %1737 = vmatmul.bf16.vlgmr.msrb.gmra.mxu1 %v4629_v36  ;;  %v3183_v1 = vld [vmem:[#allocation6 + $0x2c8] sm:$0xf]  ;;  %v2928_v8 = vor.u32 %v4131_v0, %v2927_v63  ;;  %v4151_v63 = vld [vmem:[#allocation6 + $0x18c] sm:$0xf] }
  0x78   :  { %1762 = vmatpush.bf16.msrb.mxu3 %v3596_v19  ;;  %1781 = vmatpush.bf16.msra.mxu1 %v3312_v21  ;;  %v4195_v3 = vld [vmem:[#allocation6 + $0x2e4] sm:$0xf0]  ;;  %v3025_v0 = vld [vmem:[#allocation6 + $0x1a8] sm:$0xf0] }
  0x79   :  { %1750 = vmatmul.bf16.vlgmr.msrb.gmra.mxu2 %v4623_v30  ;;  %v3439_v4 = vld [vmem:[#allocation6 + $0x4c8] sm:$0xf]  ;;  %v3184_v9 = vor.u32 %v4195_v3, %v3183_v1  ;;  %v4215_v1 = vld [vmem:[#allocation6 + $0x38c] sm:$0xf] }
  0x7a   :  { %1794 = vmatpush.bf16.msra.mxu2 %v3568_v22  ;;  %1769 = vmatpush.bf16.msra.mxu0 %v3024_v34  ;;  %v4259_v5 = vld [vmem:[#allocation6 + $0x4e4] sm:$0xf0]  ;;  %v3281_v3 = vld [vmem:[#allocation6 + $0x3a8] sm:$0xf0] }
  0x7b   :  { %1763 = vmatmul.bf16.vlgmr.msrb.gmra.mxu3 %v4627_v35  ;;  %v3695_v6 = vld [vmem:[#allocation6 + $0x6c8] sm:$0xf]  ;;  %v3440_v10 = vor.u32 %v4259_v5, %v3439_v4  ;;  %v4279_v4 = vld [vmem:[#allocation6 + $0x58c] sm:$0xf] }
  0x7c   :  { %1807 = vmatpush.bf16.msra.mxu3 %v3824_v26  ;;  %1782 = vmatpush.bf16.msra.mxu1 %v3280_v37  ;;  %v4323_v7 = vld [vmem:[#allocation6 + $0x6e4] sm:$0xf0]  ;;  %v3537_v5 = vld [vmem:[#allocation6 + $0x5a8] sm:$0xf0] }
  0x7d   :  { %v2895_v11 = vld [vmem:[#allocation6 + $0x88] sm:$0xf]  ;;  %v3696_v14 = vor.u32 %v4323_v7, %v3695_v6  ;;  %v4343_v6 = vld [vmem:[#allocation6 + $0x78c] sm:$0xf] }
  0x7e   :  { %1795 = vmatpush.bf16.msra.mxu2 %v3536_v38  ;;  %1770 = vmatpush.bf16.msra.mxu0 %v2992_v48  ;;  %v3151_v13 = vld [vmem:[#allocation6 + $0x288] sm:$0xf]  ;;  %v2896_v20 = vor.u32 %v4123_v12, %v2895_v11  ;;  %v4159_v48 = vld [vmem:[#allocation6 + $0x1cc] sm:$0xf] }
  0x7f   :  { %v4187_v15 = vld [vmem:[#allocation6 + $0x2a4] sm:$0xf0]  ;;  %v3793_v7 = vld [vmem:[#allocation6 + $0x7a8] sm:$0xf0] }
  0x80   :  { %1808 = vmatpush.bf16.msra.mxu3 %v3792_v42  ;;  %1783 = vmatpush.bf16.msra.mxu1 %v3248_v49  ;;  %v3407_v16 = vld [vmem:[#allocation6 + $0x488] sm:$0xf]  ;;  %v3152_v21 = vor.u32 %v4187_v15, %v3151_v13  ;;  %v3057_v49 = vld [vmem:[#allocation6 + $0x1e8] sm:$0xf0] }
  0x81   :  { %v4251_v17 = vld [vmem:[#allocation6 + $0x4a4] sm:$0xf0]  ;;  %v4143_v11 = vld [vmem:[#allocation6 + $0x14c] sm:$0xf] }
  0x82   :  { %1796 = vmatpush.bf16.msra.mxu2 %v3504_v50  ;;  %1771 = vmatpush.bf16.msra.mxu0 %v2960_v60  ;;  %v3663_v18 = vld [vmem:[#allocation6 + $0x688] sm:$0xf]  ;;  %v3408_v22 = vor.u32 %v4251_v17, %v3407_v16  ;;  %v4223_v50 = vld [vmem:[#allocation6 + $0x3cc] sm:$0xf]  ;;  %v3060_v60 = vor.u32 %v4159_v48, %v3057_v49 }
  0x83   :  { %v4315_v19 = vld [vmem:[#allocation6 + $0x6a4] sm:$0xf0]  ;;  %v2993_v12 = vld [vmem:[#allocation6 + $0x168] sm:$0xf0] }
  0x84   :  { %1809 = vmatpush.bf16.msra.mxu3 %v3760_v54  ;;  %1784 = vmatpush.bf16.msra.mxu1 %v3216_v61  ;;  %v2863_v23 = vld [vmem:[#allocation6 + $0x48] sm:$0xf]  ;;  %v3664_v26 = vor.u32 %v4315_v19, %v3663_v18  ;;  %v3569_v54 = vld [vmem:[#allocation6 + $0x5e8] sm:$0xf0]  ;;  %v3316_v61 = vor.u32 %v4223_v50, %v3313_v52 }
  0x85   :  { %v4115_v24 = vld [vmem:[#allocation6 + $0x64] sm:$0xf0]  ;;  %v4207_v13 = vld [vmem:[#allocation6 + $0x34c] sm:$0xf] }
  0x86   :  { %1797 = vmatpush.bf16.msra.mxu2 %v3472_v62  ;;  %1772 = vmatpush.bf16.msra.mxu0 %v2928_v8  ;;  %v3119_v25 = vld [vmem:[#allocation6 + $0x248] sm:$0xf]  ;;  %v2864_v34 = vor.u32 %v4115_v24, %v2863_v23  ;;  %v3572_v62 = vor.u32 %v4287_v53, %v3569_v54  ;;  %v3028_v8 = vor.u32 %v4151_v63, %v3025_v0  ;;  %v3249_v15 = vld [vmem:[#allocation6 + $0x368] sm:$0xf0] }
  0x87   :  { %v4179_v27 = vld [vmem:[#allocation6 + $0x264] sm:$0xf0]  ;;  %v4271_v16 = vld [vmem:[#allocation6 + $0x54c] sm:$0xf] }
  0x88   :  { %1810 = vmatpush.bf16.msra.mxu3 %v3728_v2  ;;  %1785 = vmatpush.bf16.msra.mxu1 %v3184_v9  ;;  %v3375_v28 = vld [vmem:[#allocation6 + $0x448] sm:$0xf]  ;;  %v3120_v39 = vor.u32 %v4179_v27, %v3119_v25  ;;  %v3828_v2 = vor.u32 %v4351_v57, %v3825_v58  ;;  %v3284_v9 = vor.u32 %v4215_v1, %v3281_v3  ;;  %v3505_v17 = vld [vmem:[#allocation6 + $0x568] sm:$0xf0] }
  0x89   :  { %v4243_v29 = vld [vmem:[#allocation6 + $0x464] sm:$0xf0]  ;;  %v4335_v18 = vld [vmem:[#allocation6 + $0x74c] sm:$0xf] }
  0x8a   :  { %1798 = vmatpush.bf16.msra.mxu2 %v3440_v10  ;;  %v3631_v32 = vld [vmem:[#allocation6 + $0x648] sm:$0xf]  ;;  %1773 = vmatpush.bf16.msra.mxu0 %v2896_v20  ;;  %v3376_v40 = vor.u32 %v4243_v29, %v3375_v28  ;;  %v3540_v10 = vor.u32 %v4279_v4, %v3537_v5  ;;  %v3761_v19 = vld [vmem:[#allocation6 + $0x768] sm:$0xf0]  ;;  %v2996_v20 = vor.u32 %v4143_v11, %v2993_v12 }
  0x8b   :  { %v4307_v33 = vld [vmem:[#allocation6 + $0x664] sm:$0xf0]  ;;  %v4135_v23 = vld [vmem:[#allocation6 + $0x10c] sm:$0xf] }
  0x8c   :  { %1811 = vmatpush.bf16.msra.mxu3 %v3696_v14  ;;  %v2831_v37 = vld [vmem:[#allocation6 + $0x8] sm:$0xf]  ;;  %1786 = vmatpush.bf16.msra.mxu1 %v3152_v21  ;;  %v3632_v44 = vor.u32 %v4307_v33, %v3631_v32  ;;  %v3796_v14 = vor.u32 %v4343_v6, %v3793_v7  ;;  %v3252_v21 = vor.u32 %v4207_v13, %v3249_v15  ;;  %v2961_v24 = vld [vmem:[#allocation6 + $0x128] sm:$0xf0] }
  0x8d   :  { %v4107_v38 = vld [vmem:[#allocation6 + $0x24] sm:$0xf0]  ;;  %v4199_v25 = vld [vmem:[#allocation6 + $0x30c] sm:$0xf] }
  0x8e   :  { %1799 = vmatpush.bf16.msra.mxu2 %v3408_v22  ;;  %v3087_v41 = vld [vmem:[#allocation6 + $0x208] sm:$0xf]  ;;  %1774 = vmatpush.bf16.msra.mxu0 %v2864_v34  ;;  %v2832_v51 = vor.u32 %v4107_v38, %v2831_v37  ;;  %v3508_v22 = vor.u32 %v4271_v16, %v3505_v17  ;;  %v3217_v27 = vld [vmem:[#allocation6 + $0x328] sm:$0xf0]  ;;  %v2964_v34 = vor.u32 %v4135_v23, %v2961_v24  ;;  %v4228_v24 = vld [vmem:[#allocation6 + $0x3ec] sm:$0xf0] }
  0x8f   :  { %v4171_v42 = vld [vmem:[#allocation6 + $0x224] sm:$0xf0]  ;;  %v4263_v28 = vld [vmem:[#allocation6 + $0x50c] sm:$0xf]  ;;  %v3220_v37 = vor.u32 %v4199_v25, %v3217_v27  ;;  %v3575_v25 = vld [vmem:[#allocation6 + $0x5d0] sm:$0xf] }
  0x90   :  { %v3343_v43 = vld [vmem:[#allocation6 + $0x408] sm:$0xf]  ;;  %1812 = vmatpush.bf16.msra.mxu3 %v3664_v26  ;;  %1787 = vmatpush.bf16.msra.mxu1 %v3120_v39  ;;  %v3088_v55 = vor.u32 %v4171_v42, %v3087_v41  ;;  %v3764_v26 = vor.u32 %v4335_v18, %v3761_v19  ;;  %v3473_v29 = vld [vmem:[#allocation6 + $0x528] sm:$0xf0] }
  0x91   :  { %v4235_v45 = vld [vmem:[#allocation6 + $0x424] sm:$0xf0]  ;;  %v4327_v32 = vld [vmem:[#allocation6 + $0x70c] sm:$0xf]  ;;  %v3476_v38 = vor.u32 %v4263_v28, %v3473_v29  ;;  %v3831_v29 = vld [vmem:[#allocation6 + $0x7d0] sm:$0xf] }
  0x92   :  { %v3599_v46 = vld [vmem:[#allocation6 + $0x608] sm:$0xf]  ;;  %1800 = vmatpush.bf16.msra.mxu2 %v3376_v40  ;;  %v3344_v56 = vor.u32 %v4235_v45, %v3343_v43  ;;  %1775 = vmatpush.bf16.msra.mxu0 %v2832_v51  ;;  %v3729_v33 = vld [vmem:[#allocation6 + $0x728] sm:$0xf0] }
  0x93   :  { %v4299_v47 = vld [vmem:[#allocation6 + $0x624] sm:$0xf0]  ;;  %v4127_v39 = vld [vmem:[#allocation6 + $0xcc] sm:$0xf]  ;;  %v3732_v42 = vor.u32 %v4327_v32, %v3729_v33  ;;  %v4356_v32 = vld [vmem:[#allocation6 + $0x7ec] sm:$0xf0] }
  0x94   :  { %1813 = vmatpush.bf16.msra.mxu3 %v3632_v44  ;;  %v3600_v59 = vor.u32 %v4299_v47, %v3599_v46  ;;  %1788 = vmatpush.bf16.msra.mxu1 %v3088_v55  ;;  %v2929_v40 = vld [vmem:[#allocation6 + $0xe8] sm:$0xf0] }
  0x95   :  { %1776 = vmatmul.bf16.vlgmr.msra.gmra.mxu0 %v4625_v31  ;;  %v4191_v41 = vld [vmem:[#allocation6 + $0x2cc] sm:$0xf]  ;;  %v2932_v48 = vor.u32 %v4127_v39, %v2929_v40  ;;  %v3031_v39 = vld [vmem:[#allocation6 + $0x190] sm:$0xf] }
  0x96   :  { %1801 = vmatpush.bf16.msra.mxu2 %v3344_v56  ;;  %1820 = vmatpush.bf16.msrb.mxu0 %v3060_v60  ;;  %v3185_v43 = vld [vmem:[#allocation6 + $0x2e8] sm:$0xf0]  ;;  %v4156_v40 = vld [vmem:[#allocation6 + $0x1ac] sm:$0xf0] }
  0x97   :  { %1789 = vmatmul.bf16.vlgmr.msra.gmra.mxu1 %v4629_v36  ;;  %v4255_v44 = vld [vmem:[#allocation6 + $0x4cc] sm:$0xf]  ;;  %v3188_v49 = vor.u32 %v4191_v41, %v3185_v43  ;;  %v3287_v41 = vld [vmem:[#allocation6 + $0x390] sm:$0xf] }
  0x98   :  { %1814 = vmatpush.bf16.msra.mxu3 %v3600_v59  ;;  %1833 = vmatpush.bf16.msrb.mxu1 %v3316_v61  ;;  %v3441_v45 = vld [vmem:[#allocation6 + $0x4e8] sm:$0xf0]  ;;  %v4220_v43 = vld [vmem:[#allocation6 + $0x3ac] sm:$0xf0] }
  0x99   :  { %1802 = vmatmul.bf16.vlgmr.msra.gmra.mxu2 %v4623_v30  ;;  %v4319_v46 = vld [vmem:[#allocation6 + $0x6cc] sm:$0xf]  ;;  %v3444_v50 = vor.u32 %v4255_v44, %v3441_v45  ;;  %v3543_v44 = vld [vmem:[#allocation6 + $0x590] sm:$0xf] }
  0x9a   :  { %1846 = vmatpush.bf16.msrb.mxu2 %v3572_v62  ;;  %1821 = vmatpush.bf16.msrb.mxu0 %v3028_v8  ;;  %v3697_v47 = vld [vmem:[#allocation6 + $0x6e8] sm:$0xf0]  ;;  %v4284_v45 = vld [vmem:[#allocation6 + $0x5ac] sm:$0xf0] }
  0x9b   :  { %1815 = vmatmul.bf16.vlgmr.msra.gmra.mxu3 %v4627_v35  ;;  %v4119_v51 = vld [vmem:[#allocation6 + $0x8c] sm:$0xf]  ;;  %v3700_v54 = vor.u32 %v4319_v46, %v3697_v47  ;;  %v3799_v46 = vld [vmem:[#allocation6 + $0x790] sm:$0xf] }
  0x9c   :  { %1859 = vmatpush.bf16.msrb.mxu3 %v3828_v2  ;;  %1834 = vmatpush.bf16.msrb.mxu1 %v3284_v9  ;;  %v2897_v52 = vld [vmem:[#allocation6 + $0xa8] sm:$0xf0]  ;;  %v4348_v47 = vld [vmem:[#allocation6 + $0x7ac] sm:$0xf0] }
  0x9d   :  { %v4183_v53 = vld [vmem:[#allocation6 + $0x28c] sm:$0xf]  ;;  %v2900_v60 = vor.u32 %v4119_v51, %v2897_v52  ;;  %v2999_v51 = vld [vmem:[#allocation6 + $0x150] sm:$0xf] }
  0x9e   :  { %1847 = vmatpush.bf16.msrb.mxu2 %v3540_v10  ;;  %1822 = vmatpush.bf16.msrb.mxu0 %v2996_v20  ;;  %v3153_v55 = vld [vmem:[#allocation6 + $0x2a8] sm:$0xf0]  ;;  %v3063_v20 = vld [vmem:[#allocation6 + $0x1d0] sm:$0xf] }
  0x9f   :  { %v4247_v56 = vld [vmem:[#allocation6 + $0x48c] sm:$0xf]  ;;  %v3156_v61 = vor.u32 %v4183_v53, %v3153_v55  ;;  %v4148_v52 = vld [vmem:[#allocation6 + $0x16c] sm:$0xf0] }
  0xa0   :  { %1860 = vmatpush.bf16.msrb.mxu3 %v3796_v14  ;;  %1835 = vmatpush.bf16.msrb.mxu1 %v3252_v21  ;;  %v3409_v57 = vld [vmem:[#allocation6 + $0x4a8] sm:$0xf0]  ;;  %v4164_v21 = vld [vmem:[#allocation6 + $0x1ec] sm:$0xf0] }
  0xa1   :  { %v4311_v58 = vld [vmem:[#allocation6 + $0x68c] sm:$0xf]  ;;  %v3412_v62 = vor.u32 %v4247_v56, %v3409_v57  ;;  %v3255_v53 = vld [vmem:[#allocation6 + $0x350] sm:$0xf] }
  0xa2   :  { %1848 = vmatpush.bf16.msrb.mxu2 %v3508_v22  ;;  %1823 = vmatpush.bf16.msrb.mxu0 %v2964_v34  ;;  %v3665_v59 = vld [vmem:[#allocation6 + $0x6a8] sm:$0xf0]  ;;  %v3319_v22 = vld [vmem:[#allocation6 + $0x3d0] sm:$0xf]  ;;  %v3064_v34 = vor.u32 %v4164_v21, %v3063_v20 }
  0xa3   :  { %v4111_v63 = vld [vmem:[#allocation6 + $0x4c] sm:$0xf]  ;;  %v3668_v2 = vor.u32 %v4311_v58, %v3665_v59  ;;  %v4212_v55 = vld [vmem:[#allocation6 + $0x36c] sm:$0xf0] }
  0xa4   :  { %1861 = vmatpush.bf16.msrb.mxu3 %v3764_v26  ;;  %1836 = vmatpush.bf16.msrb.mxu1 %v3220_v37  ;;  %v2865_v0 = vld [vmem:[#allocation6 + $0x68] sm:$0xf0]  ;;  %v4292_v26 = vld [vmem:[#allocation6 + $0x5ec] sm:$0xf0]  ;;  %v3320_v37 = vor.u32 %v4228_v24, %v3319_v22 }
  0xa5   :  { %v4175_v1 = vld [vmem:[#allocation6 + $0x24c] sm:$0xf]  ;;  %v2868_v8 = vor.u32 %v4111_v63, %v2865_v0  ;;  %v3511_v56 = vld [vmem:[#allocation6 + $0x550] sm:$0xf] }
  0xa6   :  { %1849 = vmatpush.bf16.msrb.mxu2 %v3476_v38  ;;  %1824 = vmatpush.bf16.msrb.mxu0 %v2932_v48  ;;  %v3121_v3 = vld [vmem:[#allocation6 + $0x268] sm:$0xf0]  ;;  %v3576_v38 = vor.u32 %v4292_v26, %v3575_v25  ;;  %v3032_v48 = vor.u32 %v4156_v40, %v3031_v39  ;;  %v4276_v57 = vld [vmem:[#allocation6 + $0x56c] sm:$0xf0] }
  0xa7   :  { %v4239_v4 = vld [vmem:[#allocation6 + $0x44c] sm:$0xf]  ;;  %v3124_v11 = vor.u32 %v4175_v1, %v3121_v3  ;;  %v3767_v58 = vld [vmem:[#allocation6 + $0x750] sm:$0xf] }
  0xa8   :  { %1862 = vmatpush.bf16.msrb.mxu3 %v3732_v42  ;;  %1837 = vmatpush.bf16.msrb.mxu1 %v3188_v49  ;;  %v3377_v5 = vld [vmem:[#allocation6 + $0x468] sm:$0xf0]  ;;  %v3832_v42 = vor.u32 %v4356_v32, %v3831_v29  ;;  %v3288_v49 = vor.u32 %v4220_v43, %v3287_v41  ;;  %v4340_v59 = vld [vmem:[#allocation6 + $0x76c] sm:$0xf0] }
  0xa9   :  { %v4303_v6 = vld [vmem:[#allocation6 + $0x64c] sm:$0xf]  ;;  %v3380_v12 = vor.u32 %v4239_v4, %v3377_v5  ;;  %v2967_v63 = vld [vmem:[#allocation6 + $0x110] sm:$0xf] }
  0xaa   :  { %1850 = vmatpush.bf16.msrb.mxu2 %v3444_v50  ;;  %v3633_v7 = vld [vmem:[#allocation6 + $0x668] sm:$0xf0]  ;;  %1825 = vmatpush.bf16.msrb.mxu0 %v2900_v60  ;;  %v3544_v50 = vor.u32 %v4284_v45, %v3543_v44  ;;  %v3000_v60 = vor.u32 %v4148_v52, %v2999_v51  ;;  %v4140_v0 = vld [vmem:[#allocation6 + $0x12c] sm:$0xf0] }
  0xab   :  { %v4103_v9 = vld [vmem:[#allocation6 + $0xc] sm:$0xf]  ;;  %v3636_v16 = vor.u32 %v4303_v6, %v3633_v7  ;;  %v3223_v1 = vld [vmem:[#allocation6 + $0x310] sm:$0xf] }
  0xac   :  { %1863 = vmatpush.bf16.msrb.mxu3 %v3700_v54  ;;  %v2833_v10 = vld [vmem:[#allocation6 + $0x28] sm:$0xf0]  ;;  %1838 = vmatpush.bf16.msrb.mxu1 %v3156_v61  ;;  %v3800_v54 = vor.u32 %v4348_v47, %v3799_v46  ;;  %v3256_v61 = vor.u32 %v4212_v55, %v3255_v53  ;;  %v4204_v3 = vld [vmem:[#allocation6 + $0x32c] sm:$0xf0] }
  0xad   :  { %v4167_v13 = vld [vmem:[#allocation6 + $0x20c] sm:$0xf]  ;;  %v2836_v23 = vor.u32 %v4103_v9, %v2833_v10  ;;  %v3479_v4 = vld [vmem:[#allocation6 + $0x510] sm:$0xf]  ;;  %v3224_v9 = vor.u32 %v4204_v3, %v3223_v1  ;;  %v4288_v1 = vld [vmem:[#allocation6 + $0x5d4] sm:$0xf] }
  0xae   :  { %1851 = vmatpush.bf16.msrb.mxu2 %v3412_v62  ;;  %v3089_v14 = vld [vmem:[#allocation6 + $0x228] sm:$0xf0]  ;;  %1826 = vmatpush.bf16.msrb.mxu0 %v2868_v8  ;;  %v3512_v62 = vor.u32 %v4276_v57, %v3511_v56  ;;  %v4268_v5 = vld [vmem:[#allocation6 + $0x52c] sm:$0xf0]  ;;  %v2968_v8 = vor.u32 %v4140_v0, %v2967_v63  ;;  %v3321_v0 = vld [vmem:[#allocation6 + $0x3f0] sm:$0xf0] }
  0xaf   :  { %v4231_v15 = vld [vmem:[#allocation6 + $0x40c] sm:$0xf]  ;;  %v3092_v27 = vor.u32 %v4167_v13, %v3089_v14  ;;  %v3735_v6 = vld [vmem:[#allocation6 + $0x710] sm:$0xf]  ;;  %v3480_v10 = vor.u32 %v4268_v5, %v3479_v4  ;;  %v4352_v5 = vld [vmem:[#allocation6 + $0x7d4] sm:$0xf] }
  0xb0   :  { %1864 = vmatpush.bf16.msrb.mxu3 %v3668_v2  ;;  %v3345_v17 = vld [vmem:[#allocation6 + $0x428] sm:$0xf0]  ;;  %1839 = vmatpush.bf16.msrb.mxu1 %v3124_v11  ;;  %v3768_v2 = vor.u32 %v4340_v59, %v3767_v58  ;;  %v4332_v7 = vld [vmem:[#allocation6 + $0x72c] sm:$0xf0] }
  0xb1   :  { %v4295_v18 = vld [vmem:[#allocation6 + $0x60c] sm:$0xf]  ;;  %v3348_v28 = vor.u32 %v4231_v15, %v3345_v17  ;;  %v2935_v11 = vld [vmem:[#allocation6 + $0xd0] sm:$0xf]  ;;  %v3736_v14 = vor.u32 %v4332_v7, %v3735_v6  ;;  %v3833_v6 = vld [vmem:[#allocation6 + $0x7f0] sm:$0xf0] }
  0xb2   :  { %v3601_v19 = vld [vmem:[#allocation6 + $0x628] sm:$0xf0]  ;;  %1852 = vmatpush.bf16.msrb.mxu2 %v3380_v12  ;;  %1827 = vmatpush.bf16.msrb.mxu0 %v2836_v23  ;;  %v4132_v12 = vld [vmem:[#allocation6 + $0xec] sm:$0xf0] }
  0xb3   :  { %v3604_v33 = vor.u32 %v4295_v18, %v3601_v19  ;;  %v3191_v13 = vld [vmem:[#allocation6 + $0x2d0] sm:$0xf]  ;;  %v2936_v20 = vor.u32 %v4132_v12, %v2935_v11  ;;  %v4152_v11 = vld [vmem:[#allocation6 + $0x194] sm:$0xf] }
  0xb4   :  { %1865 = vmatpush.bf16.msrb.mxu3 %v3636_v16  ;;  %1840 = vmatpush.bf16.msrb.mxu1 %v3092_v27  ;;  %v4196_v15 = vld [vmem:[#allocation6 + $0x2ec] sm:$0xf0]  ;;  %v3033_v12 = vld [vmem:[#allocation6 + $0x1b0] sm:$0xf0] }
  0xb5   :  { %1828 = vmatmul.bf16.vlgmr.msrb.gmra.mxu0 %v4625_v31  ;;  %v3447_v16 = vld [vmem:[#allocation6 + $0x4d0] sm:$0xf]  ;;  %v3192_v21 = vor.u32 %v4196_v15, %v3191_v13  ;;  %v4216_v13 = vld [vmem:[#allocation6 + $0x394] sm:$0xf] }
  0xb6   :  { %1853 = vmatpush.bf16.msrb.mxu2 %v3348_v28  ;;  %1872 = vmatpush.bf16.msra.mxu0 %v3064_v34  ;;  %v4260_v17 = vld [vmem:[#allocation6 + $0x4ec] sm:$0xf0]  ;;  %v3289_v15 = vld [vmem:[#allocation6 + $0x3b0] sm:$0xf0] }
  0xb7   :  { %1841 = vmatmul.bf16.vlgmr.msrb.gmra.mxu1 %v4629_v36  ;;  %v3703_v18 = vld [vmem:[#allocation6 + $0x6d0] sm:$0xf]  ;;  %v3448_v22 = vor.u32 %v4260_v17, %v3447_v16  ;;  %v4280_v16 = vld [vmem:[#allocation6 + $0x594] sm:$0xf] }
  0xb8   :  { %1866 = vmatpush.bf16.msrb.mxu3 %v3604_v33  ;;  %1885 = vmatpush.bf16.msra.mxu1 %v3320_v37  ;;  %v4324_v19 = vld [vmem:[#allocation6 + $0x6ec] sm:$0xf0]  ;;  %v3545_v17 = vld [vmem:[#allocation6 + $0x5b0] sm:$0xf0] }
  0xb9   :  { %1854 = vmatmul.bf16.vlgmr.msrb.gmra.mxu2 %v4623_v30  ;;  %v2903_v23 = vld [vmem:[#allocation6 + $0x90] sm:$0xf]  ;;  %v3704_v26 = vor.u32 %v4324_v19, %v3703_v18  ;;  %v4344_v18 = vld [vmem:[#allocation6 + $0x794] sm:$0xf] }
  0xba   :  { %1898 = vmatpush.bf16.msra.mxu2 %v3576_v38  ;;  %1873 = vmatpush.bf16.msra.mxu0 %v3032_v48  ;;  %v4124_v24 = vld [vmem:[#allocation6 + $0xac] sm:$0xf0]  ;;  %v3801_v19 = vld [vmem:[#allocation6 + $0x7b0] sm:$0xf0] }
  0xbb   :  { %1867 = vmatmul.bf16.vlgmr.msrb.gmra.mxu3 %v4627_v35  ;;  %v3159_v25 = vld [vmem:[#allocation6 + $0x290] sm:$0xf]  ;;  %v2904_v34 = vor.u32 %v4124_v24, %v2903_v23  ;;  %v4144_v23 = vld [vmem:[#allocation6 + $0x154] sm:$0xf] }
  0xbc   :  { %1911 = vmatpush.bf16.msra.mxu3 %v3832_v42  ;;  %1886 = vmatpush.bf16.msra.mxu1 %v3288_v49  ;;  %v4188_v27 = vld [vmem:[#allocation6 + $0x2ac] sm:$0xf0]  ;;  %v3001_v24 = vld [vmem:[#allocation6 + $0x170] sm:$0xf0] }
  0xbd   :  { %v3415_v28 = vld [vmem:[#allocation6 + $0x490] sm:$0xf]  ;;  %v3160_v37 = vor.u32 %v4188_v27, %v3159_v25  ;;  %v4208_v25 = vld [vmem:[#allocation6 + $0x354] sm:$0xf] }
  0xbe   :  { %1899 = vmatpush.bf16.msra.mxu2 %v3544_v50  ;;  %1874 = vmatpush.bf16.msra.mxu0 %v3000_v60  ;;  %v4252_v29 = vld [vmem:[#allocation6 + $0x4ac] sm:$0xf0]  ;;  %v4160_v60 = vld [vmem:[#allocation6 + $0x1d4] sm:$0xf] }
  0xbf   :  { %v3671_v32 = vld [vmem:[#allocation6 + $0x690] sm:$0xf]  ;;  %v3416_v38 = vor.u32 %v4252_v29, %v3415_v28  ;;  %v3257_v27 = vld [vmem:[#allocation6 + $0x370] sm:$0xf0] }
  0xc0   :  { %1912 = vmatpush.bf16.msra.mxu3 %v3800_v54  ;;  %1887 = vmatpush.bf16.msra.mxu1 %v3256_v61  ;;  %v4316_v33 = vld [vmem:[#allocation6 + $0x6ac] sm:$0xf0]  ;;  %v3065_v61 = vld [vmem:[#allocation6 + $0x1f0] sm:$0xf0] }
  0xc1   :  { %v2871_v39 = vld [vmem:[#allocation6 + $0x50] sm:$0xf]  ;;  %v3672_v42 = vor.u32 %v4316_v33, %v3671_v32  ;;  %v4272_v28 = vld [vmem:[#allocation6 + $0x554] sm:$0xf] }
  0xc2   :  { %1900 = vmatpush.bf16.msra.mxu2 %v3512_v62  ;;  %1875 = vmatpush.bf16.msra.mxu0 %v2968_v8  ;;  %v4116_v40 = vld [vmem:[#allocation6 + $0x6c] sm:$0xf0]  ;;  %v4224_v62 = vld [vmem:[#allocation6 + $0x3d4] sm:$0xf]  ;;  %v3068_v8 = vor.u32 %v4160_v60, %v3065_v61 }
  0xc3   :  { %v3127_v41 = vld [vmem:[#allocation6 + $0x250] sm:$0xf]  ;;  %v2872_v48 = vor.u32 %v4116_v40, %v2871_v39  ;;  %v3513_v29 = vld [vmem:[#allocation6 + $0x570] sm:$0xf0] }
  0xc4   :  { %1913 = vmatpush.bf16.msra.mxu3 %v3768_v2  ;;  %1888 = vmatpush.bf16.msra.mxu1 %v3224_v9  ;;  %v4180_v43 = vld [vmem:[#allocation6 + $0x26c] sm:$0xf0]  ;;  %v3577_v2 = vld [vmem:[#allocation6 + $0x5f0] sm:$0xf0]  ;;  %v3324_v9 = vor.u32 %v4224_v62, %v3321_v0 }
  0xc5   :  { %v3383_v44 = vld [vmem:[#allocation6 + $0x450] sm:$0xf]  ;;  %v3128_v51 = vor.u32 %v4180_v43, %v3127_v41  ;;  %v4336_v32 = vld [vmem:[#allocation6 + $0x754] sm:$0xf] }
  0xc6   :  { %1901 = vmatpush.bf16.msra.mxu2 %v3480_v10  ;;  %1876 = vmatpush.bf16.msra.mxu0 %v2936_v20  ;;  %v4244_v45 = vld [vmem:[#allocation6 + $0x46c] sm:$0xf0]  ;;  %v3580_v10 = vor.u32 %v4288_v1, %v3577_v2  ;;  %v3036_v20 = vor.u32 %v4152_v11, %v3033_v12  ;;  %v3769_v33 = vld [vmem:[#allocation6 + $0x770] sm:$0xf0] }
  0xc7   :  { %v3639_v46 = vld [vmem:[#allocation6 + $0x650] sm:$0xf]  ;;  %v3384_v52 = vor.u32 %v4244_v45, %v3383_v44  ;;  %v4136_v39 = vld [vmem:[#allocation6 + $0x114] sm:$0xf] }
  0xc8   :  { %1914 = vmatpush.bf16.msra.mxu3 %v3736_v14  ;;  %1889 = vmatpush.bf16.msra.mxu1 %v3192_v21  ;;  %v4308_v47 = vld [vmem:[#allocation6 + $0x66c] sm:$0xf0]  ;;  %v3836_v14 = vor.u32 %v4352_v5, %v3833_v6  ;;  %v3292_v21 = vor.u32 %v4216_v13, %v3289_v15  ;;  %v2969_v40 = vld [vmem:[#allocation6 + $0x130] sm:$0xf0]  ;;  %v4651_v6 = vld [vmem:[#allocation8] sm:$0xff] }
  0xc9   :  { %v2839_v49 = vld [vmem:[#allocation6 + $0x10] sm:$0xf]  ;;  %v3640_v56 = vor.u32 %v4308_v47, %v3639_v46  ;;  %v4200_v41 = vld [vmem:[#allocation6 + $0x314] sm:$0xf]  ;;  %v368_v15 = vperm.slane %v4651_v6, 0 }
  0xca   :  { %1902 = vmatpush.bf16.msra.mxu2 %v3448_v22  ;;  %1877 = vmatpush.bf16.msra.mxu0 %v2904_v34  ;;  %v4108_v50 = vld [vmem:[#allocation6 + $0x2c] sm:$0xf0]  ;;  %v3548_v22 = vor.u32 %v4280_v16, %v3545_v17  ;;  %v3004_v34 = vor.u32 %v4144_v23, %v3001_v24  ;;  %v3225_v43 = vld [vmem:[#allocation6 + $0x330] sm:$0xf0] }
  0xcb   :  { %v3095_v53 = vld [vmem:[#allocation6 + $0x210] sm:$0xf]  ;;  %v2840_v63 = vor.u32 %v4108_v50, %v2839_v49  ;;  %v4264_v44 = vld [vmem:[#allocation6 + $0x514] sm:$0xf]  ;;  %v3228_v49 = vor.u32 %v4200_v41, %v3225_v43  ;;  %v4165_v43 = vld [vmem:[#allocation6 + $0x1f4] sm:$0xf0] }
  0xcc   :  { %1915 = vmatpush.bf16.msra.mxu3 %v3704_v26  ;;  %1890 = vmatpush.bf16.msra.mxu1 %v3160_v37  ;;  %v4172_v54 = vld [vmem:[#allocation6 + $0x22c] sm:$0xf0]  ;;  %v3804_v26 = vor.u32 %v4344_v18, %v3801_v19  ;;  %v3260_v37 = vor.u32 %v4208_v25, %v3257_v27  ;;  %v3481_v45 = vld [vmem:[#allocation6 + $0x530] sm:$0xf0] }
  0xcd   :  { %v3351_v55 = vld [vmem:[#allocation6 + $0x410] sm:$0xf]  ;;  %v3096_v3 = vor.u32 %v4172_v54, %v3095_v53  ;;  %v4328_v46 = vld [vmem:[#allocation6 + $0x714] sm:$0xf]  ;;  %v3484_v50 = vor.u32 %v4264_v44, %v3481_v45  ;;  %v3327_v44 = vld [vmem:[#allocation6 + $0x3d8] sm:$0xf] }
  0xce   :  { %1903 = vmatpush.bf16.msra.mxu2 %v3416_v38  ;;  %v4236_v57 = vld [vmem:[#allocation6 + $0x42c] sm:$0xf0]  ;;  %1878 = vmatpush.bf16.msra.mxu0 %v2872_v48  ;;  %v3516_v38 = vor.u32 %v4272_v28, %v3513_v29  ;;  %v3737_v47 = vld [vmem:[#allocation6 + $0x730] sm:$0xf0]  ;;  %v2972_v48 = vor.u32 %v4136_v39, %v2969_v40 }
  0xcf   :  { %v3607_v58 = vld [vmem:[#allocation6 + $0x610] sm:$0xf]  ;;  %v3352_v4 = vor.u32 %v4236_v57, %v3351_v55  ;;  %v4192_v53 = vld [vmem:[#allocation6 + $0x2d4] sm:$0xf]  ;;  %v3740_v54 = vor.u32 %v4328_v46, %v3737_v47  ;;  %v4229_v46 = vld [vmem:[#allocation6 + $0x3f4] sm:$0xf0] }
  0xd0   :  { %1916 = vmatpush.bf16.msra.mxu3 %v3672_v42  ;;  %v4300_v59 = vld [vmem:[#allocation6 + $0x62c] sm:$0xf0]  ;;  %1891 = vmatpush.bf16.msra.mxu1 %v3128_v51  ;;  %v3772_v42 = vor.u32 %v4336_v32, %v3769_v33  ;;  %v4128_v51 = vld [vmem:[#allocation6 + $0xd4] sm:$0xf]  ;;  %v3583_v47 = vld [vmem:[#allocation6 + $0x5d8] sm:$0xf] }
  0xd1   :  { %v3608_v7 = vor.u32 %v4300_v59, %v3607_v58  ;;  %v3193_v55 = vld [vmem:[#allocation6 + $0x2f0] sm:$0xf0] }
  0xd2   :  { %1904 = vmatpush.bf16.msra.mxu2 %v3384_v52  ;;  %1879 = vmatpush.bf16.msra.mxu0 %v2840_v63  ;;  %v2937_v52 = vld [vmem:[#allocation6 + $0xf0] sm:$0xf0]  ;;  %v3196_v62 = vor.u32 %v4192_v53, %v3193_v55 }
  0xd3   :  { %v3449_v57 = vld [vmem:[#allocation6 + $0x4f0] sm:$0xf0]  ;;  %v2940_v60 = vor.u32 %v4128_v51, %v2937_v52  ;;  %v3839_v51 = vld [vmem:[#allocation6 + $0x7d8] sm:$0xf] }
  0xd4   :  { %1917 = vmatpush.bf16.msra.mxu3 %v3640_v56  ;;  %1892 = vmatpush.bf16.msra.mxu1 %v3096_v3  ;;  %v4256_v56 = vld [vmem:[#allocation6 + $0x4d4] sm:$0xf]  ;;  %v4357_v52 = vld [vmem:[#allocation6 + $0x7f4] sm:$0xf0] }
  0xd5   :  { %1880 = vmatmul.bf16.vlgmr.msra.gmra.mxu0 %v4625_v31  ;;  %v4320_v58 = vld [vmem:[#allocation6 + $0x6d4] sm:$0xf]  ;;  %v3452_v63 = vor.u32 %v4256_v56, %v3449_v57 }
  0xd6   :  { %1905 = vmatpush.bf16.msra.mxu2 %v3352_v4  ;;  %1924 = vmatpush.bf16.msrb.mxu0 %v3068_v8  ;;  %v3705_v59 = vld [vmem:[#allocation6 + $0x6f0] sm:$0xf0] }
  0xd7   :  { %1893 = vmatmul.bf16.vlgmr.msra.gmra.mxu1 %v4629_v36  ;;  %v4120_v61 = vld [vmem:[#allocation6 + $0x94] sm:$0xf]  ;;  %v3708_v3 = vor.u32 %v4320_v58, %v3705_v59  ;;  %v3328_v58 = vor.u32 %v4229_v46, %v3327_v44  ;;  %v2943_v46 = vld [vmem:[#allocation6 + $0xd8] sm:$0xf] }
  0xd8   :  { %1918 = vmatpush.bf16.msra.mxu3 %v3608_v7  ;;  %1937 = vmatpush.bf16.msrb.mxu1 %v3324_v9  ;;  %v2905_v0 = vld [vmem:[#allocation6 + $0xb0] sm:$0xf0] }
  0xd9   :  { %1906 = vmatmul.bf16.vlgmr.msra.gmra.mxu2 %v4623_v30  ;;  %v4184_v1 = vld [vmem:[#allocation6 + $0x294] sm:$0xf]  ;;  %v2908_v9 = vor.u32 %v4120_v61, %v2905_v0  ;;  %v4157_v61 = vld [vmem:[#allocation6 + $0x1b4] sm:$0xf0] }
  0xda   :  { %1950 = vmatpush.bf16.msrb.mxu2 %v3580_v10  ;;  %1925 = vmatpush.bf16.msrb.mxu0 %v3036_v20  ;;  %v3161_v2 = vld [vmem:[#allocation6 + $0x2b0] sm:$0xf0] }
  0xdb   :  { %1919 = vmatmul.bf16.vlgmr.msra.gmra.mxu3 %v4627_v35  ;;  %v4248_v4 = vld [vmem:[#allocation6 + $0x494] sm:$0xf]  ;;  %v3164_v11 = vor.u32 %v4184_v1, %v3161_v2  ;;  %v4221_v1 = vld [vmem:[#allocation6 + $0x3b4] sm:$0xf0] }
  0xdc   :  { %1963 = vmatpush.bf16.msrb.mxu3 %v3836_v14  ;;  %1938 = vmatpush.bf16.msrb.mxu1 %v3292_v21  ;;  %v3417_v5 = vld [vmem:[#allocation6 + $0x4b0] sm:$0xf0]  ;;  %v3551_v2 = vld [vmem:[#allocation6 + $0x598] sm:$0xf] }
  0xdd   :  { %v4312_v7 = vld [vmem:[#allocation6 + $0x694] sm:$0xf]  ;;  %v3420_v12 = vor.u32 %v4248_v4, %v3417_v5  ;;  %v3807_v5 = vld [vmem:[#allocation6 + $0x798] sm:$0xf] }
  0xde   :  { %1951 = vmatpush.bf16.msrb.mxu2 %v3548_v22  ;;  %1926 = vmatpush.bf16.msrb.mxu0 %v3004_v34  ;;  %v3673_v8 = vld [vmem:[#allocation6 + $0x6b0] sm:$0xf0]  ;;  %v1673_v23 = vpop.f32.mrf.mxu0 }
  0xdf   :  { %v4112_v10 = vld [vmem:[#allocation6 + $0x54] sm:$0xf]  ;;  %v3676_v16 = vor.u32 %v4312_v7, %v3673_v8  ;;  %v1674_v28 = vadd.f32 %v1673_v23, %v368_v15  ;;  %v4349_v7 = vld [vmem:[#allocation6 + $0x7b4] sm:$0xf0] }
  0xe0   :  { %1964 = vmatpush.bf16.msrb.mxu3 %v3804_v26  ;;  %1939 = vmatpush.bf16.msrb.mxu1 %v3260_v37  ;;  %v2873_v13 = vld [vmem:[#allocation6 + $0x70] sm:$0xf0]  ;;  %v1686_v29 = vpop.f32.mrf.mxu1  ;;  %v3808_v15 = vor.u32 %v4349_v7, %v3807_v5  ;;  %v4253_v5 = vld [vmem:[#allocation6 + $0x4b4] sm:$0xf0] }
  0xe1   :  { %v4176_v14 = vld [vmem:[#allocation6 + $0x254] sm:$0xf]  ;;  %v2876_v22 = vor.u32 %v4112_v10, %v2873_v13  ;;  %v1687_v41 = vadd.f32 %v1686_v29, %v1674_v28  ;;  %v4149_v13 = vld [vmem:[#allocation6 + $0x174] sm:$0xf0]  ;;  %v369_v29 = vperm.slane %v4651_v6, 1 }
  0xe2   :  { %1952 = vmatpush.bf16.msrb.mxu2 %v3516_v38  ;;  %1927 = vmatpush.bf16.msrb.mxu0 %v2972_v48  ;;  %v3129_v17 = vld [vmem:[#allocation6 + $0x270] sm:$0xf0]  ;;  %v4293_v48 = vld [vmem:[#allocation6 + $0x5f4] sm:$0xf0] }
  0xe3   :  { %v4240_v18 = vld [vmem:[#allocation6 + $0x454] sm:$0xf]  ;;  %v3132_v26 = vor.u32 %v4176_v14, %v3129_v17  ;;  %v3584_v59 = vor.u32 %v4293_v48, %v3583_v47  ;;  %v3263_v14 = vld [vmem:[#allocation6 + $0x358] sm:$0xf] }
  0xe4   :  { %1965 = vmatpush.bf16.msrb.mxu3 %v3772_v42  ;;  %1940 = vmatpush.bf16.msrb.mxu1 %v3228_v49  ;;  %v3385_v19 = vld [vmem:[#allocation6 + $0x470] sm:$0xf0]  ;;  %v3071_v42 = vld [vmem:[#allocation6 + $0x1d8] sm:$0xf]  ;;  %v1699_v53 = vpop.f32.mrf.mxu2 }
  0xe5   :  { %v4304_v20 = vld [vmem:[#allocation6 + $0x654] sm:$0xf]  ;;  %v3388_v27 = vor.u32 %v4240_v18, %v3385_v19  ;;  %v3072_v55 = vor.u32 %v4165_v43, %v3071_v42  ;;  %v1700_v56 = vadd.f32 %v1699_v53, %v1687_v41  ;;  %v3519_v17 = vld [vmem:[#allocation6 + $0x558] sm:$0xf] }
  0xe6   :  { %1953 = vmatpush.bf16.msrb.mxu2 %v3484_v50  ;;  %1928 = vmatpush.bf16.msrb.mxu0 %v2940_v60  ;;  %v3641_v21 = vld [vmem:[#allocation6 + $0x670] sm:$0xf0]  ;;  %v1712_v57 = vpop.f32.mrf.mxu3  ;;  %v3039_v60 = vld [vmem:[#allocation6 + $0x198] sm:$0xf]  ;;  %v1675_v4 = vpop.f32.mrf.mxu0 }
  0xe7   :  { %v4104_v24 = vld [vmem:[#allocation6 + $0x14] sm:$0xf]  ;;  %v3644_v37 = vor.u32 %v4304_v20, %v3641_v21  ;;  %v4654_v0 = vadd.f32 %v1712_v57, %v1700_v56  ;;  %v4277_v18 = vld [vmem:[#allocation6 + $0x574] sm:$0xf0] }
  0xe8   :  { %1966 = vmatpush.bf16.msrb.mxu3 %v3740_v54  ;;  %1941 = vmatpush.bf16.msrb.mxu1 %v3196_v62  ;;  %v2841_v25 = vld [vmem:[#allocation6 + $0x30] sm:$0xf0]  ;;  %v3295_v62 = vld [vmem:[#allocation6 + $0x398] sm:$0xf]  ;;  %v1688_v8 = vpop.f32.mrf.mxu1 }
  0xe9   :  { %v4168_v32 = vld [vmem:[#allocation6 + $0x214] sm:$0xf]  ;;  %v2844_v45 = vor.u32 %v4104_v24, %v2841_v25  ;;  %v3296_v10 = vor.u32 %v4221_v1, %v3295_v62  ;;  %v3775_v19 = vld [vmem:[#allocation6 + $0x758] sm:$0xf] }
  0xea   :  { %1954 = vmatpush.bf16.msrb.mxu2 %v3452_v63  ;;  %1929 = vmatpush.bf16.msrb.mxu0 %v2908_v9  ;;  %v3097_v33 = vld [vmem:[#allocation6 + $0x230] sm:$0xf0]  ;;  %v3840_v63 = vor.u32 %v4357_v52, %v3839_v51  ;;  %v3040_v9 = vor.u32 %v4157_v61, %v3039_v60  ;;  %v4341_v20 = vld [vmem:[#allocation6 + $0x774] sm:$0xf0] }
  0xeb   :  { %v4232_v34 = vld [vmem:[#allocation6 + $0x414] sm:$0xf]  ;;  %v3100_v49 = vor.u32 %v4168_v32, %v3097_v33  ;;  %v2975_v24 = vld [vmem:[#allocation6 + $0x118] sm:$0xf]  ;;  %v3776_v32 = vor.u32 %v4341_v20, %v3775_v19 }
  0xec   :  { %1967 = vmatpush.bf16.msrb.mxu3 %v3708_v3  ;;  %1942 = vmatpush.bf16.msrb.mxu1 %v3164_v11  ;;  %v3353_v38 = vld [vmem:[#allocation6 + $0x430] sm:$0xf0]  ;;  %v4285_v3 = vld [vmem:[#allocation6 + $0x5b4] sm:$0xf0]  ;;  %v1701_v21 = vpop.f32.mrf.mxu2 }
  0xed   :  { %v4296_v39 = vld [vmem:[#allocation6 + $0x614] sm:$0xf]  ;;  %v3356_v50 = vor.u32 %v4232_v34, %v3353_v38  ;;  %v3552_v11 = vor.u32 %v4285_v3, %v3551_v2  ;;  %v3231_v28 = vld [vmem:[#allocation6 + $0x318] sm:$0xf] }
  0xee   :  { %1955 = vmatpush.bf16.msrb.mxu2 %v3420_v12  ;;  %v3609_v40 = vld [vmem:[#allocation6 + $0x630] sm:$0xf0]  ;;  %1930 = vmatpush.bf16.msrb.mxu0 %v2876_v22  ;;  %v3007_v12 = vld [vmem:[#allocation6 + $0x158] sm:$0xf]  ;;  %v1714_v23 = vpop.f32.mrf.mxu3 }
  0xef   :  { %v3612_v54 = vor.u32 %v4296_v39, %v3609_v40  ;;  %v3008_v22 = vor.u32 %v4149_v13, %v3007_v12  ;;  %v4205_v33 = vld [vmem:[#allocation6 + $0x334] sm:$0xf0] }
  0xf0   :  { %1968 = vmatpush.bf16.msrb.mxu3 %v3676_v16  ;;  %1943 = vmatpush.bf16.msrb.mxu1 %v3132_v26  ;;  %v4213_v16 = vld [vmem:[#allocation6 + $0x374] sm:$0xf0]  ;;  %v3520_v26 = vor.u32 %v4277_v18, %v3519_v17  ;;  %v3232_v42 = vor.u32 %v4205_v33, %v3231_v28 }
  0xf1   :  { %v3264_v25 = vor.u32 %v4213_v16, %v3263_v14  ;;  %v3487_v34 = vld [vmem:[#allocation6 + $0x518] sm:$0xf] }
  0xf2   :  { %1956 = vmatpush.bf16.msrb.mxu2 %v3388_v27  ;;  %1931 = vmatpush.bf16.msrb.mxu0 %v2844_v45  ;;  %v4141_v27 = vld [vmem:[#allocation6 + $0x134] sm:$0xf0]  ;;  %v1725_v41 = vpop.f32.mrf.mxu0 }
  0xf3   :  { %v3743_v38 = vld [vmem:[#allocation6 + $0x718] sm:$0xf]  ;;  %v2976_v40 = vor.u32 %v4141_v27, %v2975_v24  ;;  %v1726_v44 = vadd.f32 %v1725_v41, %v369_v29 }
  0xf4   :  { %1969 = vmatpush.bf16.msrb.mxu3 %v3644_v37  ;;  %1944 = vmatpush.bf16.msrb.mxu1 %v3100_v49  ;;  %v4269_v37 = vld [vmem:[#allocation6 + $0x534] sm:$0xf0]  ;;  %v1738_v45 = vpop.f32.mrf.mxu1 }
  0xf5   :  { %1932 = vmatmul.bf16.vlgmr.msrb.gmra.mxu0 %v4625_v31  ;;  %v4333_v39 = vld [vmem:[#allocation6 + $0x734] sm:$0xf0]  ;;  %v3488_v43 = vor.u32 %v4269_v37, %v3487_v34  ;;  %v1739_v53 = vadd.f32 %v1738_v45, %v1726_v44  ;;  %v4225_v44 = vld [vmem:[#allocation6 + $0x3dc] sm:$0xf] }
  0xf6   :  { %1957 = vmatpush.bf16.msrb.mxu2 %v3356_v50  ;;  %1976 = vmatpush.bf16.msra.mxu0 %v3072_v55  ;;  %v4133_v47 = vld [vmem:[#allocation6 + $0xf4] sm:$0xf0]  ;;  %v3744_v49 = vor.u32 %v4333_v39, %v3743_v38 }
  0xf7   :  { %1945 = vmatmul.bf16.vlgmr.msrb.gmra.mxu1 %v4629_v36  ;;  %v3199_v48 = vld [vmem:[#allocation6 + $0x2d8] sm:$0xf]  ;;  %v2944_v56 = vor.u32 %v4133_v47, %v2943_v46  ;;  %v3329_v46 = vld [vmem:[#allocation6 + $0x3f8] sm:$0xf0] }
  0xf8   :  { %1970 = vmatpush.bf16.msrb.mxu3 %v3612_v54  ;;  %1989 = vmatpush.bf16.msra.mxu1 %v3328_v58  ;;  %v4197_v50 = vld [vmem:[#allocation6 + $0x2f4] sm:$0xf0]  ;;  %v4289_v47 = vld [vmem:[#allocation6 + $0x5dc] sm:$0xf] }
  0xf9   :  { %1958 = vmatmul.bf16.vlgmr.msrb.gmra.mxu2 %v4623_v30  ;;  %v3455_v51 = vld [vmem:[#allocation6 + $0x4d8] sm:$0xf]  ;;  %v3200_v57 = vor.u32 %v4197_v50, %v3199_v48  ;;  %v3585_v48 = vld [vmem:[#allocation6 + $0x5f8] sm:$0xf0] }
  0xfa   :  { %2002 = vmatpush.bf16.msra.mxu2 %v3584_v59  ;;  %1977 = vmatpush.bf16.msra.mxu0 %v3040_v9  ;;  %v4261_v52 = vld [vmem:[#allocation6 + $0x4f4] sm:$0xf0] }
  0xfb   :  { %1971 = vmatmul.bf16.vlgmr.msrb.gmra.mxu3 %v4627_v35  ;;  %v3711_v54 = vld [vmem:[#allocation6 + $0x6d8] sm:$0xf]  ;;  %v3456_v58 = vor.u32 %v4261_v52, %v3455_v51  ;;  %v4353_v51 = vld [vmem:[#allocation6 + $0x7dc] sm:$0xf] }
  0xfc   :  { %2015 = vmatpush.bf16.msra.mxu3 %v3840_v63  ;;  %1990 = vmatpush.bf16.msra.mxu1 %v3296_v10  ;;  %v4325_v55 = vld [vmem:[#allocation6 + $0x6f4] sm:$0xf0]  ;;  %v1751_v59 = vpop.f32.mrf.mxu2  ;;  %v1740_v17 = vpop.f32.mrf.mxu1  ;;  %v3841_v52 = vld [vmem:[#allocation6 + $0x7f8] sm:$0xf0] }
  0xfd   :  { %v2911_v60 = vld [vmem:[#allocation6 + $0x98] sm:$0xf]  ;;  %v3712_v63 = vor.u32 %v4325_v55, %v3711_v54  ;;  %v1752_v1 = vadd.f32 %v1751_v59, %v1739_v53  ;;  %v3332_v55 = vor.u32 %v4225_v44, %v3329_v46  ;;  %v4217_v59 = vld [vmem:[#allocation6 + $0x39c] sm:$0xf] }
  0xfe   :  { %2003 = vmatpush.bf16.msra.mxu2 %v3552_v11  ;;  %1978 = vmatpush.bf16.msra.mxu0 %v3008_v22  ;;  %v4125_v61 = vld [vmem:[#allocation6 + $0xb4] sm:$0xf0]  ;;  %v1764_v2 = vpop.f32.mrf.mxu3  ;;  %v1727_v11 = vpop.f32.mrf.mxu0  ;;  %v3201_v44 = vld [vmem:[#allocation6 + $0x2f8] sm:$0xf0] }
  0xff   :  { %v3167_v62 = vld [vmem:[#allocation6 + $0x298] sm:$0xf]  ;;  %v4661_v9 = vadd.f32 %v1764_v2, %v1752_v1  ;;  %v2912_v10 = vor.u32 %v4125_v61, %v2911_v60  ;;  %v3844_v60 = vor.u32 %v4353_v51, %v3841_v52  ;;  %v3297_v61 = vld [vmem:[#allocation6 + $0x3b8] sm:$0xf0] }
 0x100   :  { %2016 = vmatpush.bf16.msra.mxu3 %v3808_v15  ;;  %1991 = vmatpush.bf16.msra.mxu1 %v3264_v25  ;;  %v4189_v3 = vld [vmem:[#allocation6 + $0x2b4] sm:$0xf0]  ;;  %v4345_v1 = vld [vmem:[#allocation6 + $0x79c] sm:$0xf] }
 0x101   :  { %v3423_v4 = vld [vmem:[#allocation6 + $0x498] sm:$0xf]  ;;  %v3168_v12 = vor.u32 %v4189_v3, %v3167_v62  ;;  %v4281_v62 = vld [vmem:[#allocation6 + $0x59c] sm:$0xf] }
 0x102   :  { %2004 = vmatpush.bf16.msra.mxu2 %v3520_v26  ;;  %1979 = vmatpush.bf16.msra.mxu0 %v2976_v40  ;;  %v3679_v7 = vld [vmem:[#allocation6 + $0x698] sm:$0xf]  ;;  %v3424_v13 = vor.u32 %v4253_v5, %v3423_v4  ;;  %v3809_v2 = vld [vmem:[#allocation6 + $0x7b8] sm:$0xf0]  ;;  %v3300_v4 = vor.u32 %v4217_v59, %v3297_v61 }
 0x103   :  { %v4317_v8 = vld [vmem:[#allocation6 + $0x6b4] sm:$0xf0]  ;;  %v3812_v11 = vor.u32 %v4345_v1, %v3809_v2  ;;  %v3457_v46 = vld [vmem:[#allocation6 + $0x4f8] sm:$0xf0] }
 0x104   :  { %2017 = vmatpush.bf16.msra.mxu3 %v3776_v32  ;;  %1992 = vmatpush.bf16.msra.mxu1 %v3232_v42  ;;  %v2879_v14 = vld [vmem:[#allocation6 + $0x58] sm:$0xf]  ;;  %v3680_v18 = vor.u32 %v4317_v8, %v3679_v7  ;;  %v1753_v34 = vpop.f32.mrf.mxu2  ;;  %v4161_v42 = vld [vmem:[#allocation6 + $0x1dc] sm:$0xf] }
 0x105   :  { %v4117_v15 = vld [vmem:[#allocation6 + $0x74] sm:$0xf0]  ;;  %v4145_v7 = vld [vmem:[#allocation6 + $0x15c] sm:$0xf] }
 0x106   :  { %2005 = vmatpush.bf16.msra.mxu2 %v3488_v43  ;;  %1980 = vmatpush.bf16.msra.mxu0 %v2944_v56  ;;  %v3135_v16 = vld [vmem:[#allocation6 + $0x258] sm:$0xf]  ;;  %v2880_v24 = vor.u32 %v4117_v15, %v2879_v14  ;;  %v1766_v41 = vpop.f32.mrf.mxu3  ;;  %v3073_v43 = vld [vmem:[#allocation6 + $0x1f8] sm:$0xf0]  ;;  %v3588_v56 = vor.u32 %v4289_v47, %v3585_v48 }
 0x107   :  { %v4181_v19 = vld [vmem:[#allocation6 + $0x274] sm:$0xf0]  ;;  %v3076_v54 = vor.u32 %v4161_v42, %v3073_v43  ;;  %v3009_v8 = vld [vmem:[#allocation6 + $0x178] sm:$0xf0] }
 0x108   :  { %2018 = vmatpush.bf16.msra.mxu3 %v3744_v49  ;;  %1993 = vmatpush.bf16.msra.mxu1 %v3200_v57  ;;  %v3391_v20 = vld [vmem:[#allocation6 + $0x458] sm:$0xf]  ;;  %v3136_v27 = vor.u32 %v4181_v19, %v3135_v16  ;;  %v4153_v57 = vld [vmem:[#allocation6 + $0x19c] sm:$0xf]  ;;  %v3012_v17 = vor.u32 %v4145_v7, %v3009_v8 }
 0x109   :  { %v4245_v21 = vld [vmem:[#allocation6 + $0x474] sm:$0xf0]  ;;  %v3521_v14 = vld [vmem:[#allocation6 + $0x578] sm:$0xf0] }
 0x10a   :  { %2006 = vmatpush.bf16.msra.mxu2 %v3456_v58  ;;  %v3647_v22 = vld [vmem:[#allocation6 + $0x658] sm:$0xf]  ;;  %1981 = vmatpush.bf16.msra.mxu0 %v2912_v10  ;;  %v3392_v28 = vor.u32 %v4245_v21, %v3391_v20  ;;  %v3041_v58 = vld [vmem:[#allocation6 + $0x1b8] sm:$0xf0] }
 0x10b   :  { %v4309_v23 = vld [vmem:[#allocation6 + $0x674] sm:$0xf0]  ;;  %v3044_v3 = vor.u32 %v4153_v57, %v3041_v58  ;;  %v4209_v10 = vld [vmem:[#allocation6 + $0x35c] sm:$0xf] }
 0x10c   :  { %2019 = vmatpush.bf16.msra.mxu3 %v3712_v63  ;;  %v2847_v25 = vld [vmem:[#allocation6 + $0x18] sm:$0xf]  ;;  %1994 = vmatpush.bf16.msra.mxu1 %v3168_v12  ;;  %v3648_v37 = vor.u32 %v4309_v23, %v3647_v22  ;;  %v3553_v63 = vld [vmem:[#allocation6 + $0x5b8] sm:$0xf0]  ;;  %v370_v23 = vperm.slane %v4651_v6, 2 }
 0x10d   :  { %v4109_v26 = vld [vmem:[#allocation6 + $0x34] sm:$0xf0]  ;;  %v3556_v5 = vor.u32 %v4281_v62, %v3553_v63  ;;  %v3265_v12 = vld [vmem:[#allocation6 + $0x378] sm:$0xf0] }
 0x10e   :  { %2007 = vmatpush.bf16.msra.mxu2 %v3424_v13  ;;  %v3103_v29 = vld [vmem:[#allocation6 + $0x218] sm:$0xf]  ;;  %1982 = vmatpush.bf16.msra.mxu0 %v2880_v24  ;;  %v2848_v45 = vor.u32 %v4109_v26, %v2847_v25  ;;  %v4273_v13 = vld [vmem:[#allocation6 + $0x55c] sm:$0xf]  ;;  %v3268_v19 = vor.u32 %v4209_v10, %v3265_v12 }
 0x10f   :  { %v4173_v32 = vld [vmem:[#allocation6 + $0x234] sm:$0xf0]  ;;  %v4337_v15 = vld [vmem:[#allocation6 + $0x75c] sm:$0xf]  ;;  %v3524_v20 = vor.u32 %v4273_v13, %v3521_v14 }
 0x110   :  { %v3359_v33 = vld [vmem:[#allocation6 + $0x418] sm:$0xf]  ;;  %2020 = vmatpush.bf16.msra.mxu3 %v3680_v18  ;;  %1995 = vmatpush.bf16.msra.mxu1 %v3136_v27  ;;  %v3104_v49 = vor.u32 %v4173_v32, %v3103_v29  ;;  %v3777_v16 = vld [vmem:[#allocation6 + $0x778] sm:$0xf0] }
 0x111   :  { %v4237_v38 = vld [vmem:[#allocation6 + $0x434] sm:$0xf0]  ;;  %v4137_v18 = vld [vmem:[#allocation6 + $0x11c] sm:$0xf]  ;;  %v3780_v24 = vor.u32 %v4337_v15, %v3777_v16 }
 0x112   :  { %v3615_v39 = vld [vmem:[#allocation6 + $0x618] sm:$0xf]  ;;  %2008 = vmatpush.bf16.msra.mxu2 %v3392_v28  ;;  %v3360_v50 = vor.u32 %v4237_v38, %v3359_v33  ;;  %1983 = vmatpush.bf16.msra.mxu0 %v2848_v45  ;;  %v2977_v21 = vld [vmem:[#allocation6 + $0x138] sm:$0xf0]  ;;  %v1777_v33 = vpop.f32.mrf.mxu0 }
 0x113   :  { %v4301_v40 = vld [vmem:[#allocation6 + $0x634] sm:$0xf0]  ;;  %v4201_v22 = vld [vmem:[#allocation6 + $0x31c] sm:$0xf]  ;;  %v2980_v32 = vor.u32 %v4137_v18, %v2977_v21  ;;  %v1778_v38 = vadd.f32 %v1777_v33, %v370_v23 }
 0x114   :  { %2021 = vmatpush.bf16.msra.mxu3 %v3648_v37  ;;  %v3616_v53 = vor.u32 %v4301_v40, %v3615_v39  ;;  %1996 = vmatpush.bf16.msra.mxu1 %v3104_v49  ;;  %v3233_v25 = vld [vmem:[#allocation6 + $0x338] sm:$0xf0]  ;;  %v1790_v39 = vpop.f32.mrf.mxu1 }
 0x115   :  { %1984 = vmatmul.bf16.vlgmr.msra.gmra.mxu0 %v4625_v31  ;;  %v4265_v26 = vld [vmem:[#allocation6 + $0x51c] sm:$0xf]  ;;  %v3236_v34 = vor.u32 %v4201_v22, %v3233_v25  ;;  %v1791_v47 = vadd.f32 %v1790_v39, %v1778_v38 }
 0x116   :  { %2009 = vmatpush.bf16.msra.mxu2 %v3360_v50  ;;  %2028 = vmatpush.bf16.msrb.mxu0 %v3076_v54  ;;  %v3489_v27 = vld [vmem:[#allocation6 + $0x538] sm:$0xf0] }
 0x117   :  { %1997 = vmatmul.bf16.vlgmr.msra.gmra.mxu1 %v4629_v36  ;;  %v4329_v28 = vld [vmem:[#allocation6 + $0x71c] sm:$0xf]  ;;  %v3492_v37 = vor.u32 %v4265_v26, %v3489_v27 }
 0x118   :  { %2022 = vmatpush.bf16.msra.mxu3 %v3616_v53  ;;  %2041 = vmatpush.bf16.msrb.mxu1 %v3332_v55  ;;  %v3745_v29 = vld [vmem:[#allocation6 + $0x738] sm:$0xf0] }
 0x119   :  { %2010 = vmatmul.bf16.vlgmr.msra.gmra.mxu2 %v4623_v30  ;;  %v4129_v40 = vld [vmem:[#allocation6 + $0xdc] sm:$0xf]  ;;  %v3748_v43 = vor.u32 %v4329_v28, %v3745_v29 }
 0x11a   :  { %2054 = vmatpush.bf16.msrb.mxu2 %v3588_v56  ;;  %2029 = vmatpush.bf16.msrb.mxu0 %v3044_v3  ;;  %v2945_v41 = vld [vmem:[#allocation6 + $0xf8] sm:$0xf0] }
 0x11b   :  { %2023 = vmatmul.bf16.vlgmr.msra.gmra.mxu3 %v4627_v35  ;;  %v4193_v42 = vld [vmem:[#allocation6 + $0x2dc] sm:$0xf]  ;;  %v2948_v50 = vor.u32 %v4129_v40, %v2945_v41  ;;  %v371_v41 = vperm.slane %v4651_v6, 3 }
 0x11c   :  { %2067 = vmatpush.bf16.msrb.mxu3 %v3844_v60  ;;  %2042 = vmatpush.bf16.msrb.mxu1 %v3300_v4  ;;  %v4257_v45 = vld [vmem:[#allocation6 + $0x4dc] sm:$0xf]  ;;  %v3204_v51 = vor.u32 %v4193_v42, %v3201_v44  ;;  %v1803_v53 = vpop.f32.mrf.mxu2  ;;  %v1779_v4 = vpop.f32.mrf.mxu0 }
 0x11d   :  { %v4321_v48 = vld [vmem:[#allocation6 + $0x6dc] sm:$0xf]  ;;  %v3460_v52 = vor.u32 %v4257_v45, %v3457_v46  ;;  %v1804_v58 = vadd.f32 %v1803_v53, %v1791_v47  ;;  %v1792_v12 = vpop.f32.mrf.mxu1 }
 0x11e   :  { %2055 = vmatpush.bf16.msrb.mxu2 %v3556_v5  ;;  %2030 = vmatpush.bf16.msrb.mxu0 %v3012_v17  ;;  %v3713_v49 = vld [vmem:[#allocation6 + $0x6f8] sm:$0xf0]  ;;  %v1816_v59 = vpop.f32.mrf.mxu3 }
 0x11f   :  { %v4121_v54 = vld [vmem:[#allocation6 + $0x9c] sm:$0xf]  ;;  %v3716_v57 = vor.u32 %v4321_v48, %v3713_v49  ;;  %v4668_v2 = vadd.f32 %v1816_v59, %v1804_v58 }
 0x120   :  { %2068 = vmatpush.bf16.msrb.mxu3 %v3812_v11  ;;  %2043 = vmatpush.bf16.msrb.mxu1 %v3268_v19  ;;  %v2913_v55 = vld [vmem:[#allocation6 + $0xb8] sm:$0xf0] }
 0x121   :  { %v4185_v56 = vld [vmem:[#allocation6 + $0x29c] sm:$0xf]  ;;  %v2916_v3 = vor.u32 %v4121_v54, %v2913_v55 }
 0x122   :  { %2056 = vmatpush.bf16.msrb.mxu2 %v3524_v20  ;;  %2031 = vmatpush.bf16.msrb.mxu0 %v2980_v32  ;;  %v3169_v60 = vld [vmem:[#allocation6 + $0x2b8] sm:$0xf0] }
 0x123   :  { %v4249_v61 = vld [vmem:[#allocation6 + $0x49c] sm:$0xf]  ;;  %v3172_v5 = vor.u32 %v4185_v56, %v3169_v60 }
 0x124   :  { %2069 = vmatpush.bf16.msrb.mxu3 %v3780_v24  ;;  %2044 = vmatpush.bf16.msrb.mxu1 %v3236_v34  ;;  %v3425_v62 = vld [vmem:[#allocation6 + $0x4b8] sm:$0xf0]  ;;  %v1805_v25 = vpop.f32.mrf.mxu2 }
 0x125   :  { %v4313_v63 = vld [vmem:[#allocation6 + $0x69c] sm:$0xf]  ;;  %v3428_v7 = vor.u32 %v4249_v61, %v3425_v62 }
 0x126   :  { %2057 = vmatpush.bf16.msrb.mxu2 %v3492_v37  ;;  %v3681_v1 = vld [vmem:[#allocation6 + $0x6b8] sm:$0xf0]  ;;  %2032 = vmatpush.bf16.msrb.mxu0 %v2948_v50  ;;  %v1818_v32 = vpop.f32.mrf.mxu3 }
 0x127   :  { %v4113_v8 = vld [vmem:[#allocation6 + $0x5c] sm:$0xf]  ;;  %v3684_v13 = vor.u32 %v4313_v63, %v3681_v1  ;;  %v2080_v32 = vadd.f32 %v4661_v9, %v4654_v0 }
 0x128   :  { %2070 = vmatpush.bf16.msrb.mxu3 %v3748_v43  ;;  %2045 = vmatpush.bf16.msrb.mxu1 %v3204_v51  ;;  %v2881_v10 = vld [vmem:[#allocation6 + $0x78] sm:$0xf0] }
 0x129   :  { %v4177_v11 = vld [vmem:[#allocation6 + $0x25c] sm:$0xf]  ;;  %v2884_v19 = vor.u32 %v4113_v8, %v2881_v10 }
 0x12a   :  { %2058 = vmatpush.bf16.msrb.mxu2 %v3460_v52  ;;  %v3137_v14 = vld [vmem:[#allocation6 + $0x278] sm:$0xf0]  ;;  %2033 = vmatpush.bf16.msrb.mxu0 %v2916_v3 }
 0x12b   :  { %v4241_v15 = vld [vmem:[#allocation6 + $0x45c] sm:$0xf]  ;;  %v3140_v20 = vor.u32 %v4177_v11, %v3137_v14 }
 0x12c   :  { %2071 = vmatpush.bf16.msrb.mxu3 %v3716_v57  ;;  %v3393_v16 = vld [vmem:[#allocation6 + $0x478] sm:$0xf0]  ;;  %2046 = vmatpush.bf16.msrb.mxu1 %v3172_v5 }
 0x12d   :  { %v4305_v17 = vld [vmem:[#allocation6 + $0x65c] sm:$0xf]  ;;  %v3396_v21 = vor.u32 %v4241_v15, %v3393_v16 }
 0x12e   :  { %v3649_v18 = vld [vmem:[#allocation6 + $0x678] sm:$0xf0]  ;;  %2059 = vmatpush.bf16.msrb.mxu2 %v3428_v7  ;;  %2034 = vmatpush.bf16.msrb.mxu0 %v2884_v19  ;;  %v373_v19 = vperm.slane %v4651_v6, 5 }
 0x12f   :  { %v4105_v22 = vld [vmem:[#allocation6 + $0x1c] sm:$0xf]  ;;  %v3652_v26 = vor.u32 %v4305_v17, %v3649_v18 }
 0x130   :  { %v2849_v23 = vld [vmem:[#allocation6 + $0x38] sm:$0xf0]  ;;  %2072 = vmatpush.bf16.msrb.mxu3 %v3684_v13  ;;  %2047 = vmatpush.bf16.msrb.mxu1 %v3140_v20  ;;  %v374_v20 = vperm.slane %v4651_v6, 6 }
 0x131   :  { %v4169_v24 = vld [vmem:[#allocation6 + $0x21c] sm:$0xf]  ;;  %v2852_v37 = vor.u32 %v4105_v22, %v2849_v23  ;;  %v4373_v22 = vld [vmem:[#allocation9 + $0x78] sm:$0xff] }
 0x132   :  { %v3105_v27 = vld [vmem:[#allocation6 + $0x238] sm:$0xf0]  ;;  %2060 = vmatpush.bf16.msrb.mxu2 %v3396_v21  ;;  %v1829_v42 = vpop.f32.mrf.mxu0  ;;  %v4365_v21 = vld [vmem:[#allocation9 + $0x38] sm:$0xff] }
 0x133   :  { %v4233_v28 = vld [vmem:[#allocation6 + $0x41c] sm:$0xf]  ;;  %v3108_v38 = vor.u32 %v4169_v24, %v3105_v27  ;;  %2035 = vmatpush.bf16.msrb.mxu0 %v2852_v37  ;;  %v1830_v43 = vadd.f32 %v1829_v42, %v371_v41  ;;  %v4381_v23 = vld [vmem:[#allocation9 + $0xb8] sm:$0xff]  ;;  %v2091_v41 = vmul.f32 %v4661_v9, %v4661_v9 }
 0x134   :  { %v3361_v29 = vld [vmem:[#allocation6 + $0x438] sm:$0xf0]  ;;  %2073 = vmatpush.bf16.msrb.mxu3 %v3652_v26  ;;  %v1842_v44 = vpop.f32.mrf.mxu1  ;;  %v4389_v24 = vld [vmem:[#allocation9 + $0xf8] sm:$0xff] }
 0x135   :  { %v4297_v33 = vld [vmem:[#allocation6 + $0x61c] sm:$0xf]  ;;  %v3364_v39 = vor.u32 %v4233_v28, %v3361_v29  ;;  %2048 = vmatpush.bf16.msrb.mxu1 %v3108_v38  ;;  %v1843_v45 = vadd.f32 %v1842_v44, %v1830_v43  ;;  %v375_v28 = vperm.slane %v4651_v6, 7 }
 0x136   :  { %v3617_v34 = vld [vmem:[#allocation6 + $0x638] sm:$0xf0]  ;;  %2036 = vmatmul.bf16.vlgmr.msrb.gmra.mxu0 %v4625_v31 }
 0x137   :  { %v3620_v40 = vor.u32 %v4297_v33, %v3617_v34  ;;  %2061 = vmatpush.bf16.msrb.mxu2 %v3364_v39  ;;  %2676 = vmatpush.bf16.msra.mxu0 %v4365_v21  ;;  %v2081_v39 = vadd.f32 %v2080_v32, %v4668_v2  ;;  %v4361_v21 = vld [vmem:[#allocation9 + $0x18] sm:$0xff]  ;;  %v4367_v32 = vld [vmem:[#allocation9 + $0x48] sm:$0xff] }
 0x138   :  { %2049 = vmatmul.bf16.vlgmr.msrb.gmra.mxu1 %v4629_v36  ;;  %v372_v36 = vperm.slane %v4651_v6, 4  ;;  %v2090_v6 = vmul.f32 %v4654_v0, %v4654_v0 }
 0x139   :  { %2074 = vmatpush.bf16.msrb.mxu3 %v3620_v40  ;;  %2689 = vmatpush.bf16.msra.mxu1 %v4373_v22  ;;  %v4369_v22 = vld [vmem:[#allocation9 + $0x58] sm:$0xff] }
 0x13a   :  { %2062 = vmatmul.bf16.vlgmr.msrb.gmra.mxu2 %v4623_v30  ;;  %v1831_v50 = vpop.f32.mrf.mxu0 }
 0x13b   :  { %2702 = vmatpush.bf16.msra.mxu2 %v4381_v23  ;;  %v2098_v50 = vadd.f32 %v2091_v41, %v2090_v6  ;;  %v4377_v23 = vld [vmem:[#allocation9 + $0x98] sm:$0xff] }
 0x13c   :  { %2075 = vmatmul.bf16.vlgmr.msrb.gmra.mxu3 %v4627_v35  ;;  %v1855_v46 = vpop.f32.mrf.mxu2  ;;  %v1844_v51 = vpop.f32.mrf.mxu1  ;;  %v4397_v41 = vld [vmem:[#allocation9 + $0x138] sm:$0xff] }
 0x13d   :  { %v1856_v47 = vadd.f32 %v1855_v46, %v1843_v45  ;;  %2715 = vmatpush.bf16.msra.mxu3 %v4389_v24  ;;  %v2092_v45 = vmul.f32 %v4668_v2, %v4668_v2  ;;  %v4385_v24 = vld [vmem:[#allocation9 + $0xd8] sm:$0xff] }
 0x13e   :  { %v1868_v48 = vpop.f32.mrf.mxu3  ;;  %v4421_v6 = vld [vmem:[#allocation9 + $0x1f8] sm:$0xff] }
 0x13f   :  { %v4675_v49 = vadd.f32 %v1868_v48, %v1856_v47 }
 0x141   :  { %v2082_v42 = vadd.f32 %v2081_v39, %v4675_v49  ;;  %v2093_v51 = vmul.f32 %v4675_v49, %v4675_v49  ;;  %v4374_v39 = vld [vmem:[#allocation9 + $0x80] sm:$0xff] }
 0x144   :  { %v1857_v31 = vpop.f32.mrf.mxu2 }
 0x146   :  { %v1870_v52 = vpop.f32.mrf.mxu3 }
 0x152   :  { %v1881_v30 = vpop.f32.mrf.mxu0 }
 0x153   :  { %v1882_v53 = vadd.f32 %v1881_v30, %v372_v36 }
 0x154   :  { %v1894_v35 = vpop.f32.mrf.mxu1 }
 0x155   :  { %v1895_v54 = vadd.f32 %v1894_v35, %v1882_v53  ;;  %v2099_v35 = vadd.f32 %v2098_v50, %v2092_v45  ;;  %v4396_v45 = vld [vmem:[#allocation9 + $0x130] sm:$0xff] }
 0x15a   :  { %v1883_v59 = vpop.f32.mrf.mxu0 }
 0x15c   :  { %v1907_v55 = vpop.f32.mrf.mxu2  ;;  %v1896_v60 = vpop.f32.mrf.mxu1 }
 0x15d   :  { %v1908_v56 = vadd.f32 %v1907_v55, %v1895_v54 }
 0x15e   :  { %v1920_v57 = vpop.f32.mrf.mxu3 }
 0x15f   :  { %v4678_v58 = vadd.f32 %v1920_v57, %v1908_v56  ;;  %v2100_v57 = vadd.f32 %v2099_v35, %v2093_v51  ;;  %v4420_v51 = vld [vmem:[#allocation9 + $0x1f0] sm:$0xff]  ;;  %v4394_v35 = vld [vmem:[#allocation9 + $0x120] sm:$0xff] }
 0x161   :  { %v2083_v46 = vadd.f32 %v2082_v42, %v4678_v58  ;;  %v2094_v54 = vmul.f32 %v4678_v58, %v4678_v58  ;;  %v4405_v42 = vld [vmem:[#allocation9 + $0x178] sm:$0xff] }
 0x164   :  { %v1909_v61 = vpop.f32.mrf.mxu2 }
 0x165   :  { %v2101_v61 = vadd.f32 %v2100_v57, %v2094_v54  ;;  %v4402_v54 = vld [vmem:[#allocation9 + $0x160] sm:$0xff] }
 0x166   :  { %v1922_v62 = vpop.f32.mrf.mxu3  ;;  %v4418_v57 = vld [vmem:[#allocation9 + $0x1e0] sm:$0xff] }
 0x172   :  { %v1933_v63 = vpop.f32.mrf.mxu0 }
 0x173   :  { %v1934_v25 = vadd.f32 %v1933_v63, %v373_v19  ;;  %v4378_v19 = vld [vmem:[#allocation9 + $0xa0] sm:$0xff] }
 0x174   :  { %v1946_v1 = vpop.f32.mrf.mxu1 }
 0x175   :  { %v1947_v27 = vadd.f32 %v1946_v1, %v1934_v25  ;;  %v4360_v25 = vld [vmem:[#allocation9 + $0x10] sm:$0xff] }
 0x17a   :  { %v1935_v5 = vpop.f32.mrf.mxu0 }
 0x17c   :  { %v1959_v3 = vpop.f32.mrf.mxu2  ;;  %v1948_v7 = vpop.f32.mrf.mxu1 }
 0x17d   :  { %v1960_v33 = vadd.f32 %v1959_v3, %v1947_v27  ;;  %v4376_v27 = vld [vmem:[#allocation9 + $0x90] sm:$0xff] }
 0x17e   :  { %v1972_v4 = vpop.f32.mrf.mxu3 }
 0x17f   :  { %v4689_v43 = vadd.f32 %v1972_v4, %v1960_v33  ;;  %v4375_v33 = vld [vmem:[#allocation9 + $0x88] sm:$0xff] }
 0x181   :  { %v2084_v30 = vadd.f32 %v2083_v46, %v4689_v43  ;;  %v2095_v59 = vmul.f32 %v4689_v43, %v4689_v43  ;;  %v4404_v46 = vld [vmem:[#allocation9 + $0x170] sm:$0xff] }
 0x183   :  { %v2102_v4 = vadd.f32 %v2101_v61, %v2095_v59 }
 0x184   :  { %v1961_v8 = vpop.f32.mrf.mxu2 }
 0x185   :  { %v4364_v8 = vld [vmem:[#allocation9 + $0x30] sm:$0xff] }
 0x186   :  { %v1974_v10 = vpop.f32.mrf.mxu3  ;;  %2677 = vmatpush.bf16.msra.mxu0 %v4364_v8  ;;  %v4400_v8 = vld [vmem:[#allocation9 + $0x150] sm:$0xff] }
 0x187   :  { %v4372_v10 = vld [vmem:[#allocation9 + $0x70] sm:$0xff] }
 0x188   :  { %2690 = vmatpush.bf16.msra.mxu1 %v4372_v10 }
 0x192   :  { %v1985_v11 = vpop.f32.mrf.mxu0 }
 0x193   :  { %v1986_v26 = vadd.f32 %v1985_v11, %v374_v20  ;;  %v4380_v11 = vld [vmem:[#allocation9 + $0xb0] sm:$0xff]  ;;  %v4386_v20 = vld [vmem:[#allocation9 + $0xe0] sm:$0xff] }
 0x194   :  { %v1998_v12 = vpop.f32.mrf.mxu1  ;;  %2703 = vmatpush.bf16.msra.mxu2 %v4380_v11  ;;  %v4408_v11 = vld [vmem:[#allocation9 + $0x190] sm:$0xff] }
 0x195   :  { %v1999_v29 = vadd.f32 %v1998_v12, %v1986_v26  ;;  %v4388_v12 = vld [vmem:[#allocation9 + $0xf0] sm:$0xff] }
 0x196   :  { %2716 = vmatpush.bf16.msra.mxu3 %v4388_v12  ;;  %v4368_v26 = vld [vmem:[#allocation9 + $0x50] sm:$0xff] }
 0x197   :  { %v4416_v12 = vld [vmem:[#allocation9 + $0x1d0] sm:$0xff] }
 0x19a   :  { %v1987_v15 = vpop.f32.mrf.mxu0 }
 0x19b   :  { %v4379_v15 = vld [vmem:[#allocation9 + $0xa8] sm:$0xff] }
 0x19c   :  { %v2011_v13 = vpop.f32.mrf.mxu2  ;;  %v2000_v16 = vpop.f32.mrf.mxu1  ;;  %2704 = vmatpush.bf16.msra.mxu2 %v4379_v15  ;;  %v4407_v15 = vld [vmem:[#allocation9 + $0x188] sm:$0xff] }
 0x19d   :  { %v2012_v40 = vadd.f32 %v2011_v13, %v1999_v29  ;;  %v4363_v13 = vld [vmem:[#allocation9 + $0x28] sm:$0xff] }
 0x19e   :  { %v2024_v14 = vpop.f32.mrf.mxu3  ;;  %v4387_v16 = vld [vmem:[#allocation9 + $0xe8] sm:$0xff]  ;;  %2678 = vmatpush.bf16.msra.mxu0 %v4363_v13 }
 0x19f   :  { %v4696_v47 = vadd.f32 %v2024_v14, %v2012_v40  ;;  %v4371_v14 = vld [vmem:[#allocation9 + $0x68] sm:$0xff]  ;;  %2717 = vmatpush.bf16.msra.mxu3 %v4387_v16  ;;  %v4382_v40 = vld [vmem:[#allocation9 + $0xc0] sm:$0xff] }
 0x1a0   :  { %2691 = vmatpush.bf16.msra.mxu1 %v4371_v14  ;;  %2705 = vmatpush.bf16.msra.mxu2 %v4378_v19  ;;  %v4359_v29 = vld [vmem:[#allocation9 + $0x8] sm:$0xff] }
 0x1a1   :  { %v2085_v56 = vadd.f32 %v2084_v30, %v4696_v47  ;;  %v2096_v62 = vmul.f32 %v4696_v47, %v4696_v47  ;;  %v4419_v30 = vld [vmem:[#allocation9 + $0x1e8] sm:$0xff] }
 0x1a2   :  { %v4391_v13 = vld [vmem:[#allocation9 + $0x108] sm:$0xff] }
 0x1a3   :  { %v2103_v5 = vadd.f32 %v2102_v4, %v2096_v62  ;;  %2718 = vmatpush.bf16.msra.mxu3 %v4386_v20  ;;  %v4417_v4 = vld [vmem:[#allocation9 + $0x1d8] sm:$0xff]  ;;  %v4399_v14 = vld [vmem:[#allocation9 + $0x148] sm:$0xff]  ;;  %v4406_v20 = vld [vmem:[#allocation9 + $0x180] sm:$0xff] }
 0x1a4   :  { %v2013_v17 = vpop.f32.mrf.mxu2  ;;  %2706 = vmatpush.bf16.msra.mxu2 %v4377_v23  ;;  %v4415_v16 = vld [vmem:[#allocation9 + $0x1c8] sm:$0xff] }
 0x1a5   :  { %v4362_v17 = vld [vmem:[#allocation9 + $0x20] sm:$0xff] }
 0x1a6   :  { %v2026_v18 = vpop.f32.mrf.mxu3  ;;  %2679 = vmatpush.bf16.msra.mxu0 %v4362_v17  ;;  %v4390_v17 = vld [vmem:[#allocation9 + $0x100] sm:$0xff] }
 0x1a7   :  { %v4370_v18 = vld [vmem:[#allocation9 + $0x60] sm:$0xff]  ;;  %2719 = vmatpush.bf16.msra.mxu3 %v4385_v24 }
 0x1a8   :  { %2692 = vmatpush.bf16.msra.mxu1 %v4370_v18  ;;  %2707 = vmatpush.bf16.msra.mxu2 %v4376_v27  ;;  %v4398_v18 = vld [vmem:[#allocation9 + $0x140] sm:$0xff] }
 0x1aa   :  { %2680 = vmatpush.bf16.msra.mxu0 %v4361_v21  ;;  %v4414_v21 = vld [vmem:[#allocation9 + $0x1c0] sm:$0xff] }
 0x1ac   :  { %2693 = vmatpush.bf16.msra.mxu1 %v4369_v22  ;;  %2708 = vmatpush.bf16.msra.mxu2 %v4375_v33 }
 0x1ae   :  { %2681 = vmatpush.bf16.msra.mxu0 %v4360_v25 }
 0x1b0   :  { %2694 = vmatpush.bf16.msra.mxu1 %v4368_v26  ;;  %2709 = vmatpush.bf16.msra.mxu2 %v4374_v39 }
 0x1b2   :  { %2682 = vmatpush.bf16.msra.mxu0 %v4359_v29 }
 0x1b3   :  { %v2037_v34 = vpop.f32.mrf.mxu0 }
 0x1b4   :  { %v2038_v37 = vadd.f32 %v2037_v34, %v375_v28  ;;  %v4384_v28 = vld [vmem:[#allocation9 + $0xd0] sm:$0xff]  ;;  %v4383_v34 = vld [vmem:[#allocation9 + $0xc8] sm:$0xff]  ;;  %2695 = vmatpush.bf16.msra.mxu1 %v4367_v32 }
 0x1b5   :  { %v2050_v38 = vpop.f32.mrf.mxu1  ;;  %2720 = vmatpush.bf16.msra.mxu3 %v4384_v28 }
 0x1b6   :  { %v2051_v44 = vadd.f32 %v2050_v38, %v2038_v37  ;;  %v4358_v37 = vld [vmem:[#allocation9] sm:$0xff] }
 0x1b7   :  { %v4366_v38 = vld [vmem:[#allocation9 + $0x40] sm:$0xff]  ;;  %2683 = vmatpush.bf16.msra.mxu0 %v4358_v37 }
 0x1b8   :  { %2696 = vmatpush.bf16.msra.mxu1 %v4366_v38 }
 0x1b9   :  { %2721 = vmatpush.bf16.msra.mxu3 %v4383_v34 }
 0x1bb   :  { %v2039_v36 = vpop.f32.mrf.mxu0  ;;  %2728 = vmatpush.bf16.msrb.mxu0 %v4397_v41 }
 0x1bc   :  { %2741 = vmatpush.bf16.msrb.mxu1 %v4405_v42  ;;  %v4411_v36 = vld [vmem:[#allocation9 + $0x1a8] sm:$0xff] }
 0x1bd   :  { %v2063_v48 = vpop.f32.mrf.mxu2  ;;  %v2052_v53 = vpop.f32.mrf.mxu1  ;;  %2722 = vmatpush.bf16.msra.mxu3 %v4382_v40 }
 0x1be   :  { %v2064_v31 = vadd.f32 %v2063_v48, %v2051_v44  ;;  %v4413_v44 = vld [vmem:[#allocation9 + $0x1b8] sm:$0xff]  ;;  %v4412_v48 = vld [vmem:[#allocation9 + $0x1b0] sm:$0xff] }
 0x1bf   :  { %v2076_v52 = vpop.f32.mrf.mxu3  ;;  %2754 = vmatpush.bf16.msrb.mxu2 %v4413_v44  ;;  %2729 = vmatpush.bf16.msrb.mxu0 %v4396_v45 }
 0x1c0   :  { %v4703_v55 = vadd.f32 %v2076_v52, %v2064_v31  ;;  %2742 = vmatpush.bf16.msrb.mxu1 %v4404_v46  ;;  %v4395_v31 = vld [vmem:[#allocation9 + $0x128] sm:$0xff] }
 0x1c1   :  { %2767 = vmatpush.bf16.msrb.mxu3 %v4421_v6  ;;  %v4403_v52 = vld [vmem:[#allocation9 + $0x168] sm:$0xff] }
 0x1c2   :  { %v2086_v60 = vadd.f32 %v2085_v56, %v4703_v55  ;;  %v2097_v3 = vmul.f32 %v4703_v55, %v4703_v55  ;;  %v4410_v56 = vld [vmem:[#allocation9 + $0x1a0] sm:$0xff] }
 0x1c3   :  { %2755 = vmatpush.bf16.msrb.mxu2 %v4412_v48  ;;  %2730 = vmatpush.bf16.msrb.mxu0 %v4395_v31 }
 0x1c4   :  { %2087 = vadd.xlane.f32.xlu0 %v2086_v60  ;;  %v2104_v7 = vadd.f32 %v2103_v5, %v2097_v3  ;;  %2743 = vmatpush.bf16.msrb.mxu1 %v4403_v52  ;;  %v4409_v3 = vld [vmem:[#allocation9 + $0x198] sm:$0xff] }
 0x1c5   :  { %v2065_v63 = vpop.f32.mrf.mxu2  ;;  %2768 = vmatpush.bf16.msrb.mxu3 %v4420_v51 }
 0x1c6   :  { %v4393_v63 = vld [vmem:[#allocation9 + $0x118] sm:$0xff] }
 0x1c7   :  { %v2078_v1 = vpop.f32.mrf.mxu3  ;;  %2756 = vmatpush.bf16.msrb.mxu2 %v4411_v36  ;;  %2731 = vmatpush.bf16.msrb.mxu0 %v4394_v35 }
 0x1c8   :  { %2744 = vmatpush.bf16.msrb.mxu1 %v4402_v54  ;;  %v4401_v1 = vld [vmem:[#allocation9 + $0x158] sm:$0xff] }
 0x1c9   :  { %2769 = vmatpush.bf16.msrb.mxu3 %v4419_v30 }
 0x1cb   :  { %2757 = vmatpush.bf16.msrb.mxu2 %v4410_v56  ;;  %2732 = vmatpush.bf16.msrb.mxu0 %v4393_v63 }
 0x1cc   :  { %2105 = vadd.xlane.f32.xlu0 %v2104_v7  ;;  %2745 = vmatpush.bf16.msrb.mxu1 %v4401_v1  ;;  %v4392_v7 = vld [vmem:[#allocation9 + $0x110] sm:$0xff] }
 0x1cd   :  { %2770 = vmatpush.bf16.msrb.mxu3 %v4418_v57 }
 0x1cf   :  { %2758 = vmatpush.bf16.msrb.mxu2 %v4409_v3  ;;  %2733 = vmatpush.bf16.msrb.mxu0 %v4392_v7 }
 0x1d0   :  { %2746 = vmatpush.bf16.msrb.mxu1 %v4400_v8 }
 0x1d1   :  { %2771 = vmatpush.bf16.msrb.mxu3 %v4417_v4 }
 0x1d3   :  { %2759 = vmatpush.bf16.msrb.mxu2 %v4408_v11  ;;  %2734 = vmatpush.bf16.msrb.mxu0 %v4391_v13 }
 0x1d4   :  { %2747 = vmatpush.bf16.msrb.mxu1 %v4399_v14 }
 0x1d5   :  { %2772 = vmatpush.bf16.msrb.mxu3 %v4416_v12 }
 0x1d7   :  { %2760 = vmatpush.bf16.msrb.mxu2 %v4407_v15  ;;  %2735 = vmatpush.bf16.msrb.mxu0 %v4390_v17 }
 0x1d8   :  { %2748 = vmatpush.bf16.msrb.mxu1 %v4398_v18 }
 0x1d9   :  { %2773 = vmatpush.bf16.msrb.mxu3 %v4415_v16 }
 0x1db   :  { %2761 = vmatpush.bf16.msrb.mxu2 %v4406_v20 }
 0x1dd   :  { %2774 = vmatpush.bf16.msrb.mxu3 %v4414_v21 }
 0x237   :  { %v2088_v50 = vpop.xlane.xlu0 %2087 }
 0x238   :  { %v4713_v53 = vmul.f32 0.0009765625, %v2088_v50 }
 0x23a   :  { %v2108_v60 = vmul.f32 %v4713_v53, %v4713_v53  ;;  %v2111_v27 = vsub.f32 %v4654_v0, %v4713_v53  ;;  %v2112_v28 = vsub.f32 %v4661_v9, %v4713_v53  ;;  %v2113_v29 = vsub.f32 %v4668_v2, %v4713_v53 }
 0x23b   :  { %v2114_v32 = vsub.f32 %v4675_v49, %v4713_v53  ;;  %v2115_v49 = vsub.f32 %v4678_v58, %v4713_v53  ;;  %v2116_v51 = vsub.f32 %v4689_v43, %v4713_v53  ;;  %v2117_v31 = vsub.f32 %v4696_v47, %v4713_v53 }
 0x23c   :  { %v2118_v52 = vsub.f32 %v4703_v55, %v4713_v53  ;;  %v2291_v53 = vstv %s4745_s4 }
 0x23f   :  { %v2106_v59 = vpop.xlane.xlu0 %2105 }
 0x240   :  { %v2107_v61 = vmul.f32 0.0009765625, %v2106_v59 }
 0x242   :  { %v2109_v62 = vsub.f32 %v2107_v61, %v2108_v60 }
 0x244   :  { %v2110_v5 = vmax.f32 %v2109_v62, 0.0 }
 0x246   :  { %v2119_v10 = vadd.f32 1e-05, %v2110_v5 }
 0x248   :  { %4434 = vrsqrt.f32 %v2119_v10  ;;  %vm2126_vm1 = vweird.f32 %v2119_v10 }
 0x24e   :  { %v4435_v19 = vpop.eup %4434 }
 0x24f   :  { %v2121_v22 = vmul.f32 %v4435_v19, %v2119_v10  ;;  %vm2127_vm0 = vweird.f32 %v4435_v19 }
 0x250   :  { %vm2128_vm2 = vmor %vm2126_vm1, %vm2127_vm0 }
 0x251   :  { %v2122_v23 = vmul.f32 %v4435_v19, %v2121_v22 }
 0x253   :  { %v2123_v24 = vmul.f32 0.5, %v2122_v23 }
 0x255   :  { %v2124_v25 = vsub.f32 1.5, %v2123_v24 }
 0x257   :  { %v2125_v26 = vmul.f32 %v4435_v19, %v2124_v25 }
 0x259   :  { %v2129_v33 = vsel %vm2128_vm2, %v4435_v19, %v2125_v26 }
 0x25a   :  { %v2130_v34 = vmul.f32 %v2129_v33, %v2111_v27  ;;  %v2131_v37 = vmul.f32 %v2129_v33, %v2112_v28  ;;  %v2132_v38 = vmul.f32 %v2129_v33, %v2113_v29  ;;  %v2133_v39 = vmul.f32 %v2129_v33, %v2114_v32 }
 0x25b   :  { %v2134_v36 = vmul.f32 %v2129_v33, %v2115_v49  ;;  %v2135_v30 = vmul.f32 %v2129_v33, %v2116_v51  ;;  %v2136_v35 = vmul.f32 %v2129_v33, %v2117_v31  ;;  %v2137_v54 = vmul.f32 %v2129_v33, %v2118_v52 }
 0x25c   :  { %v2138_v40 = vmul.f32 0.01, %v2130_v34  ;;  %v2139_v41 = vmul.f32 0.01, %v2131_v37  ;;  %v2140_v42 = vmul.f32 0.01, %v2132_v38 }
 0x25d   :  { %v2141_v44 = vmul.f32 0.01, %v2133_v39  ;;  %v2142_v56 = vmul.f32 0.01, %v2134_v36  ;;  %v2143_v57 = vmul.f32 0.01, %v2135_v30 }
 0x25e   :  { %v2146_v6 = vmax.f32 %v2130_v34, %v2138_v40  ;;  %v2147_v0 = vmax.f32 %v2131_v37, %v2139_v41  ;;  %v2148_v45 = vmax.f32 %v2132_v38, %v2140_v42  ;;  %v2144_v59 = vmul.f32 0.01, %v2136_v35 }
 0x25f   :  { %v2149_v46 = vmax.f32 %v2133_v39, %v2141_v44  ;;  %v2145_v60 = vmul.f32 0.01, %v2137_v54  ;;  %v2150_v58 = vmax.f32 %v2134_v36, %v2142_v56  ;;  %v2151_v61 = vmax.f32 %v2135_v30, %v2143_v57 }
 0x260   :  { %v2154_v9 = vpack.c.bf16 %v2146_v6, %v2146_v6  ;;  %v2155_v48 = vpack.c.bf16 %v2147_v0, %v2147_v0  ;;  %v2156_v50 = vpack.c.bf16 %v2148_v45, %v2148_v45  ;;  %v2152_v62 = vmax.f32 %v2136_v35, %v2144_v59 }
 0x261   :  { %v2157_v2 = vpack.c.bf16 %v2149_v46, %v2149_v46  ;;  %v2153_v43 = vmax.f32 %v2137_v54, %v2145_v60  ;;  %v2158_v63 = vpack.c.bf16 %v2150_v58, %v2150_v58  ;;  %v2159_v1 = vpack.c.bf16 %v2151_v61, %v2151_v61 }
 0x262   :  { %2684 = vmatmul.bf16.vlgmr.msra.gmra.mxu0 %v2154_v9  ;;  %2697 = vmatmul.bf16.vlgmr.msra.gmra.mxu1 %v2155_v48  ;;  %v2160_v3 = vpack.c.bf16 %v2152_v62, %v2152_v62 }
 0x263   :  { %2710 = vmatmul.bf16.vlgmr.msra.gmra.mxu2 %v2156_v50  ;;  %2723 = vmatmul.bf16.vlgmr.msra.gmra.mxu3 %v2157_v2  ;;  %v2161_v4 = vpack.c.bf16 %v2153_v43, %v2153_v43 }
 0x272   :  { %2736 = vmatmul.bf16.vlgmr.msrb.gmra.mxu0 %v2158_v63  ;;  %2749 = vmatmul.bf16.vlgmr.msrb.gmra.mxu1 %v2159_v1 }
 0x273   :  { %2762 = vmatmul.bf16.vlgmr.msrb.gmra.mxu2 %v2160_v3  ;;  %2775 = vmatmul.bf16.vlgmr.msrb.gmra.mxu3 %v2161_v4 }
 0x2df   :  { %v2685_v47 = vpop.f32.mrf.mxu0  ;;  %v2698_v55 = vpop.f32.mrf.mxu1 }
 0x2e0   :  { %v2686_v5 = vadd.f32 %v2685_v47, %v2291_v53 }
 0x2e2   :  { %v2699_v12 = vadd.f32 %v2698_v55, %v2686_v5 }
 0x2e6   :  { %v2711_v7 = vpop.f32.mrf.mxu2  ;;  %v2724_v8 = vpop.f32.mrf.mxu3 }
 0x2e7   :  { %v2687_v10 = vpop.f32.mrf.mxu0  ;;  %v2700_v11 = vpop.f32.mrf.mxu1  ;;  %v2712_v13 = vadd.f32 %v2711_v7, %v2699_v12 }
 0x2e9   :  { %v2725_v16 = vadd.f32 %v2724_v8, %v2712_v13 }
 0x2ee   :  { %v2713_v14 = vpop.f32.mrf.mxu2  ;;  %v2726_v15 = vpop.f32.mrf.mxu3 }
 0x2ef   :  { %v2737_v17 = vpop.f32.mrf.mxu0  ;;  %v2750_v18 = vpop.f32.mrf.mxu1 }
 0x2f0   :  { %v2738_v19 = vadd.f32 %v2737_v17, %v2725_v16 }
 0x2f2   :  { %v2751_v20 = vadd.f32 %v2750_v18, %v2738_v19 }
 0x2f6   :  { %v2763_v21 = vpop.f32.mrf.mxu2  ;;  %v2776_v22 = vpop.f32.mrf.mxu3 }
 0x2f7   :  { %v2764_v23 = vadd.f32 %v2763_v21, %v2751_v20  ;;  %v2739_v24 = vpop.f32.mrf.mxu0  ;;  %v2752_v25 = vpop.f32.mrf.mxu1 }
 0x2f9   :  { %v2777_v26 = vadd.f32 %v2776_v22, %v2764_v23 }
 0x2fb   :  { %v4101_v27 = vmul.f32 -1.442695, %v2777_v26 }
 0x2fd   :  { %4436 = vpow2.f32 %v4101_v27 }
 0x2fe   :  { %v2765_v28 = vpop.f32.mrf.mxu2  ;;  %v2778_v29 = vpop.f32.mrf.mxu3 }
 0x303   :  { %v4437_v32 = vpop.eup %4436 }
 0x304   :  { %v2783_v33 = vadd.f32 1.0, %v4437_v32 }
 0x306   :  { %4438 = vrcp.f32 %v2783_v33  ;;  %v2795_v39 = vand.u32 2147483648, %v2783_v33  ;;  %v2793_v41 = vand.u32 2147483647, %v2783_v33  ;;  %vm2789_vm4 = vweird.f32 %v2783_v33 }
 0x308   :  { %v2796_v44 = vor.u32 1.1754944e-38, %v2795_v39  ;;  %vm2794_vm6 = vcmp.eq.f32.partialorder %v2793_v41, 8.507059e+37 }
 0x30c   :  { %v4439_v34 = vpop.eup %4438 }
 0x30d   :  { %v2785_v37 = vmul.f32 %v4439_v34, %v2783_v33  ;;  %vm2790_vm3 = vweird.f32 %v4439_v34 }
 0x30e   :  { %vm2791_vm5 = vmor %vm2789_vm4, %vm2790_vm3 }
 0x30f   :  { %v2786_v38 = vsub.f32 1.0, %v2785_v37 }
 0x311   :  { %v2787_v40 = vmul.f32 %v4439_v34, %v2786_v38 }
 0x313   :  { %v2788_v42 = vadd.f32 %v4439_v34, %v2787_v40 }
 0x315   :  { %v2792_v6 = vsel %vm2791_vm5, %v4439_v34, %v2788_v42 }
 0x316   :  { %v2797_v0 = vsel %vm2794_vm6, %v2796_v44, %v2792_v6 }
 0x317   :  { %2799 = vst [vmem:[#allocation11] sm:$0xff] %v2797_v0 }
 0x318   :  { %2803 = vsyncadd [#allocation5], 96  ;;  %s2806_s18 = sshll.u32 %s4746_s5, 4  ;;  %s4578_s19 = smov [#allocation11]   ;;  %s2807_s18 = int_to_ptr.hbm [resolvable:$true] %s2806_s18 }
 0x319   :  { %s2804_s20 = sshll.u32 %s4578_s19, 4  ;;  %s4579_s21 = smov 2   ;;  %s2805_s20 = int_to_ptr.vmem [resolvable:$true] %s2804_s20 }
 0x31a   :  { %2812 = dma.vmem_to_hbm [thread:$0]  %s2805_s20, 32, %s2807_s18, [#allocation5], %s4570_s27, %s4570_s27, %s4579_s21  }
 0x31b   :  { %4566 = dma.done.wait [#allocation5], 128  }
 0x31c   :  { %4567 = vsyncadd [#allocation5], 4294967168 }
 0x31d   :  { %2817 = vsyncpa [#allocation4], 1 }
 0x31e   :  { %2818 = vsyncpa [#allocation7], 1 }
 0x31f   :  { %2819 = vsyncpa [#allocation10], 1 }
 0x320   :  { %2820 = vsyncpa [#allocation5], 1 }

</bundles_post_ra>
